<compile_context>
chip_gen: v6e
topology: v6e:2x2x1
jax: 0.10.0
libtpu: 0.0.40
codegen_flags: <defaults>
</compile_context>

<pallas_src>
import jax
import jax.numpy as jnp
from jax import lax
from jax.experimental import pallas as pl
from jax.experimental.pallas import tpu as pltpu


# ----------------------------------------------------------------------------
# Kernel: fused upsample(x2, nearest) + 3x3 conv as one im2col matmul per image,
# emitting a lane-dense (4*Cout, H*W) result plus per-image BN statistics.
# ----------------------------------------------------------------------------
def _upconv_im2col_kernel(xp_ref, w_ref, y_ref, stat_ref):
    # xp_ref  : (1, H+2, W+2, Cin)   zero-padded NHWC input, one image
    # w_ref   : (4*Cout, 9*Cin)      phase-combined im2col weights
    #                                row = (2a+b)*Cout + co, col = (3r+c)*Cin + ci
    # y_ref   : (1, 4*Cout, H*W)     conv output, channel-major (lane-dense H*W)
    # stat_ref: (1, 4*Cout, 2)       per-image [sum, sum_sq] per (phase, channel)
    H = xp_ref.shape[1] - 2
    W = xp_ref.shape[2] - 2
    Cin = xp_ref.shape[3]

    xp = xp_ref[0]                                        # (H+2, W+2, Cin)

    # 9 unique shifted windows, each sliced exactly once; one concat + one reshape
    # builds the (H*W, 9*Cin) im2col patch matrix (no per-phase duplication).
    wins = [xp[r:r + H, c:c + W, :] for r in range(3) for c in range(3)]
    p9 = jnp.concatenate(wins, axis=2).reshape(H * W, 9 * Cin)

    # Single MXU contraction, emitted as W @ P^T so the result is (4*Cout, H*W):
    # minor dim = H*W -> unmasked lane-dense stores and dense accumulator vregs.
    acc = lax.dot_general(
        w_ref[...], p9,
        dimension_numbers=(((1,), (1,)), ((), ())),
        preferred_element_type=jnp.float32)               # (4*Cout, H*W)

    y_ref[0] = acc

    # BN statistics on the dense layout (lane reductions -> XLU slot, f32).
    s = jnp.sum(acc, axis=1, keepdims=True)               # (4*Cout, 1)
    sq = jnp.sum(acc * acc, axis=1, keepdims=True)        # (4*Cout, 1)
    stat_ref[0] = jnp.concatenate([s, sq], axis=1)        # (4*Cout, 2)


def _pack_phase_weights(w):
    """PyTorch (Cout, Cin, 3, 3) -> (4*Cout, 9*Cin) phase-combined im2col weights.

    Row (2a+b)*Cout + co, column (3*(a+dr) + (b+dc))*Cin + ci holds the summed 3x3
    taps multiplying x_pad[i+a+dr, j+b+dc, ci] when producing the fused
    "nearest x2 upsample -> 3x3 conv (pad 1)" output pixel (2i+a, 2j+b, co).
    Window/phase pairs that do not contribute stay zero.
    """
    Cout, Cin = w.shape[0], w.shape[1]
    wt = w.astype(jnp.float32)
    sets = (((0,), (1, 2)), ((0, 1), (2,)))               # [phase][tap] -> 3x3 idx
    w9 = jnp.zeros((4 * Cout, 9 * Cin), jnp.float32)
    for a in range(2):
        for b in range(2):
            for dr in range(2):
                for dc in range(2):
                    blk = jnp.zeros((Cout, Cin), jnp.float32)
                    for kh in sets[a][dr]:
                        for kw in sets[b][dc]:
                            blk = blk + wt[:, :, kh, kw]
                    r0 = (2 * a + b) * Cout
                    c0 = (3 * (a + dr) + (b + dc)) * Cin
                    w9 = w9.at[r0:r0 + Cout, c0:c0 + Cin].set(blk)
    return w9


def up_conv_forward(x_nchw, w, b, gamma, beta, eps=1e-5):
    """x_nchw: (N, Cin, H, W) f32. Returns (N, Cout, 2H, 2W) f32."""
    del b  # conv bias is cancelled exactly by the train-mode BatchNorm mean
    N, Cin, H, W = x_nchw.shape
    Cout = w.shape[0]
    H2, W2 = 2 * H, 2 * W

    # NCHW -> NHWC + 1-pixel zero pad of the ORIGINAL (small) input: XLA fuses the
    # transpose and pad into one copy pass; the x2 upsample never touches HBM.
    x = jnp.transpose(x_nchw, (0, 2, 3, 1)).astype(jnp.float32)
    xp = jnp.pad(x, ((0, 0), (1, 1), (1, 1), (0, 0)))      # (N, H+2, W+2, Cin)
    w9 = _pack_phase_weights(w)

    conv_y, stats = pl.pallas_call(
        _upconv_im2col_kernel,
        out_shape=(jax.ShapeDtypeStruct((N, 4 * Cout, H * W), jnp.float32),
                   jax.ShapeDtypeStruct((N, 4 * Cout, 2), jnp.float32)),
        grid_spec=pltpu.PrefetchScalarGridSpec(
            num_scalar_prefetch=0,
            grid=(N,),
            in_specs=[
                pl.BlockSpec((1, H + 2, W + 2, Cin), lambda n: (n, 0, 0, 0)),
                pl.BlockSpec((4 * Cout, 9 * Cin), lambda n: (0, 0)),
            ],
            out_specs=[
                pl.BlockSpec((1, 4 * Cout, H * W), lambda n: (n, 0, 0)),
                pl.BlockSpec((1, 4 * Cout, 2), lambda n: (n, 0, 0)),
            ],
        ),
        compiler_params=pltpu.CompilerParams(
            dimension_semantics=("parallel",),            # megacore: one image/core
            vmem_limit_bytes=32 * 1024 * 1024),           # safe on v5e/v6e/v7x
    )(xp, w9)

    # BatchNorm2d (training-mode batch stats) from the in-kernel partial sums.
    count = jnp.float32(N * H2 * W2)
    sum_c = jnp.sum(stats[:, :, 0].reshape(N, 4, Cout), axis=(0, 1))     # (Cout,)
    sumsq_c = jnp.sum(stats[:, :, 1].reshape(N, 4, Cout), axis=(0, 1))   # (Cout,)
    mean = sum_c / count
    # NOTE: E[x^2]-E[x]^2 in f32 (clamped at 0); fine at these scales — switch to
    # a compensated two-pass variance for much larger N*H*W.
    var = jnp.maximum(sumsq_c / count - mean * mean, 0.0)
    inv_std = lax.rsqrt(var + eps)
    scale = gamma.astype(jnp.float32) * inv_std
    shift = beta.astype(jnp.float32) - mean * scale

    # Fused epilogue in plain JAX: per-channel affine + ReLU are folded by XLA into
    # the single de-interleaving transpose (one read + one write of conv_y).
    scale4 = jnp.tile(scale, 4).reshape(1, 4 * Cout, 1)
    shift4 = jnp.tile(shift, 4).reshape(1, 4 * Cout, 1)
    y = jnp.maximum(conv_y * scale4 + shift4, 0.0)
    # (n, a, b, c, i, j) -> (n, c, 2i+a, 2j+b)
    y6 = y.reshape(N, 2, 2, Cout, H, W)
    return jnp.transpose(y6, (0, 3, 4, 1, 5, 2)).reshape(N, Cout, H2, W2)


def _reference(x_nchw, w, b, gamma, beta, eps=1e-5):
    """Pure-JAX reference of the same forward pass (for verification)."""
    x = jnp.repeat(jnp.repeat(x_nchw, 2, axis=2), 2, axis=3)
    y = lax.conv_general_dilated(
        x, w, window_strides=(1, 1), padding=((1, 1), (1, 1)),
        dimension_numbers=("NCHW", "OIHW", "NCHW"))
    y = y + b.reshape(1, -1, 1, 1)
    mean = jnp.mean(y, axis=(0, 2, 3), keepdims=True)
    var = jnp.var(y, axis=(0, 2, 3), keepdims=True)
    y = (y - mean) * lax.rsqrt(var + eps)
    y = y * gamma.reshape(1, -1, 1, 1) + beta.reshape(1, -1, 1, 1)
    return jnp.maximum(y, 0.0)


if __name__ == "__main__":
    key = jax.random.PRNGKey(0)
    k_x, k_w, k_b, k_g, k_be = jax.random.split(key, 5)

    N, ch_in, ch_out, H, W = 2, 4, 8, 16, 16

    x = jax.random.normal(k_x, (N, ch_in, H, W), dtype=jnp.float32)
    # Conv2d(ch_in, ch_out, 3, 1, 1, bias=True) params (deterministic synthetic init)
    w = jax.random.normal(k_w, (ch_out, ch_in, 3, 3), dtype=jnp.float32) * 0.1
    b = jax.random.normal(k_b, (ch_out,), dtype=jnp.float32) * 0.1
    # BatchNorm2d(ch_out) affine params
    gamma = 1.0 + 0.1 * jax.random.normal(k_g, (ch_out,), dtype=jnp.float32)
    beta = 0.1 * jax.random.normal(k_be, (ch_out,), dtype=jnp.float32)

    out = jax.jit(up_conv_forward)(x, w, b, gamma, beta)
    out = jax.block_until_ready(out)

    ref = _reference(x, w, b, gamma, beta)
    assert out.shape == (N, ch_out, 2 * H, 2 * W), out.shape
    err = float(jnp.max(jnp.abs(out - ref)))
    assert jnp.allclose(out, ref, atol=1e-4, rtol=1e-4), err

    print("KERNEL_OK")
</pallas_src>

<mosaic_0001>
module attributes {stable_mosaic.version = 11 : i64} {
  func.func @_upconv_im2col_kernel(%arg0: i32, %arg1: memref<1x18x18x4xf32, #tpu.memory_space<vmem>>, %arg2: memref<32x36xf32, #tpu.memory_space<vmem>>, %arg3: memref<1x32x256xf32, #tpu.memory_space<vmem>>, %arg4: memref<1x32x2xf32, #tpu.memory_space<vmem>>) attributes {dimension_semantics = [#tpu.dimension_semantics<parallel>], iteration_bounds = array<i64: 2>, scalar_prefetch = 0 : i64, scratch_operands = 0 : i64, tpu.core_type = #tpu.core_type<tc>, window_params = [{transform_indices = @transform_0, window_bounds = array<i64: 1, 18, 18, 4>}, {pipeline_mode = #tpu.pipeline_mode<synchronous>, transform_indices = @transform_1, window_bounds = array<i64: 32, 36>}, {transform_indices = @transform_2, window_bounds = array<i64: 1, 32, 256>}, {transform_indices = @transform_3, window_bounds = array<i64: 1, 32, 2>}]} {
    %c0 = arith.constant 0 : index
    %c0_0 = arith.constant 0 : index
    %c0_1 = arith.constant 0 : index
    %c0_2 = arith.constant 0 : index
    %0 = vector.load %arg1[%c0, %c0_0, %c0_1, %c0_2] : memref<1x18x18x4xf32, #tpu.memory_space<vmem>>, vector<1x18x18x4xf32>
    %1 = vector.shape_cast %0 : vector<1x18x18x4xf32> to vector<18x18x4xf32>
    %2 = vector.extract_strided_slice %1 {offsets = [0, 0, 0], sizes = [16, 16, 4], strides = [1, 1, 1]} : vector<18x18x4xf32> to vector<16x16x4xf32>
    %3 = vector.extract_strided_slice %1 {offsets = [0, 1, 0], sizes = [16, 16, 4], strides = [1, 1, 1]} : vector<18x18x4xf32> to vector<16x16x4xf32>
    %4 = vector.extract_strided_slice %1 {offsets = [0, 2, 0], sizes = [16, 16, 4], strides = [1, 1, 1]} : vector<18x18x4xf32> to vector<16x16x4xf32>
    %5 = vector.extract_strided_slice %1 {offsets = [1, 0, 0], sizes = [16, 16, 4], strides = [1, 1, 1]} : vector<18x18x4xf32> to vector<16x16x4xf32>
    %6 = vector.extract_strided_slice %1 {offsets = [1, 1, 0], sizes = [16, 16, 4], strides = [1, 1, 1]} : vector<18x18x4xf32> to vector<16x16x4xf32>
    %7 = vector.extract_strided_slice %1 {offsets = [1, 2, 0], sizes = [16, 16, 4], strides = [1, 1, 1]} : vector<18x18x4xf32> to vector<16x16x4xf32>
    %8 = vector.extract_strided_slice %1 {offsets = [2, 0, 0], sizes = [16, 16, 4], strides = [1, 1, 1]} : vector<18x18x4xf32> to vector<16x16x4xf32>
    %9 = vector.extract_strided_slice %1 {offsets = [2, 1, 0], sizes = [16, 16, 4], strides = [1, 1, 1]} : vector<18x18x4xf32> to vector<16x16x4xf32>
    %10 = vector.extract_strided_slice %1 {offsets = [2, 2, 0], sizes = [16, 16, 4], strides = [1, 1, 1]} : vector<18x18x4xf32> to vector<16x16x4xf32>
    %11 = tpu.concatenate %2, %3, %4, %5, %6, %7, %8, %9, %10 in 2 : vector<16x16x4xf32>, vector<16x16x4xf32>, vector<16x16x4xf32>, vector<16x16x4xf32>, vector<16x16x4xf32>, vector<16x16x4xf32>, vector<16x16x4xf32>, vector<16x16x4xf32>, vector<16x16x4xf32> -> vector<16x16x36xf32>
    %12 = vector.shape_cast %11 : vector<16x16x36xf32> to vector<256x36xf32>
    %c0_3 = arith.constant 0 : index
    %c0_4 = arith.constant 0 : index
    %13 = vector.load %arg2[%c0_3, %c0_4] : memref<32x36xf32, #tpu.memory_space<vmem>>, vector<32x36xf32>
    %cst = arith.constant dense<0.000000e+00> : vector<32x256xf32>
    %14 = tpu.matmul %13, %12, %cst {dimension_numbers = #tpu.dot_dimension_numbers<[1], [1], [0], [0], [0, 0, 1, 0], [], []>} : vector<32x36xf32>, vector<256x36xf32>, vector<32x256xf32> -> vector<32x256xf32>
    %c0_5 = arith.constant 0 : index
    %c0_6 = arith.constant 0 : index
    %c0_7 = arith.constant 0 : index
    %15 = vector.load %arg3[%c0_5, %c0_6, %c0_7] : memref<1x32x256xf32, #tpu.memory_space<vmem>>, vector<1x32x256xf32>
    %16 = vector.shape_cast %15 : vector<1x32x256xf32> to vector<32x256xf32>
    %17 = vector.shape_cast %14 : vector<32x256xf32> to vector<1x32x256xf32>
    tpu.vector_store %arg3[%c0_5, %c0_6, %c0_7], %17 {strides = array<i32>} : memref<1x32x256xf32, #tpu.memory_space<vmem>>, vector<1x32x256xf32>,
    %cst_8 = arith.constant dense<0.000000e+00> : vector<32xf32>
    %18 = vector.multi_reduction <add>, %14, %cst_8 [1] : vector<32x256xf32> to vector<32xf32>
    %19 = vector.shape_cast %18 : vector<32xf32> to vector<32x1xf32>
    %20 = arith.mulf %14, %14 : vector<32x256xf32>
    %cst_9 = arith.constant dense<0.000000e+00> : vector<32xf32>
    %21 = vector.multi_reduction <add>, %20, %cst_9 [1] : vector<32x256xf32> to vector<32xf32>
    %22 = vector.shape_cast %21 : vector<32xf32> to vector<32x1xf32>
    %23 = tpu.concatenate %19, %22 in 1 : vector<32x1xf32>, vector<32x1xf32> -> vector<32x2xf32>
    %c0_10 = arith.constant 0 : index
    %c0_11 = arith.constant 0 : index
    %c0_12 = arith.constant 0 : index
    %24 = vector.load %arg4[%c0_10, %c0_11, %c0_12] : memref<1x32x2xf32, #tpu.memory_space<vmem>>, vector<1x32x2xf32>
    %25 = vector.shape_cast %24 : vector<1x32x2xf32> to vector<32x2xf32>
    %26 = vector.shape_cast %23 : vector<32x2xf32> to vector<1x32x2xf32>
    tpu.vector_store %arg4[%c0_10, %c0_11, %c0_12], %26 {strides = array<i32>} : memref<1x32x2xf32, #tpu.memory_space<vmem>>, vector<1x32x2xf32>,
    return
  }
  func.func @transform_0(%arg0: i32) -> (i32, i32, i32, i32) {
    %c0_i32 = arith.constant 0 : i32
    %c0_i32_0 = arith.constant 0 : i32
    %c0_i32_1 = arith.constant 0 : i32
    %c0_i32_2 = arith.constant 0 : i32
    return %arg0, %c0_i32, %c0_i32_0, %c0_i32_1 : i32, i32, i32, i32
  }
  func.func @transform_1(%arg0: i32) -> (i32, i32) {
    %c0_i32 = arith.constant 0 : i32
    %c0_i32_0 = arith.constant 0 : i32
    %c0_i32_1 = arith.constant 0 : i32
    return %c0_i32, %c0_i32_0 : i32, i32
  }
  func.func @transform_2(%arg0: i32) -> (i32, i32, i32) {
    %c0_i32 = arith.constant 0 : i32
    %c0_i32_0 = arith.constant 0 : i32
    %c0_i32_1 = arith.constant 0 : i32
    return %arg0, %c0_i32, %c0_i32_0 : i32, i32, i32
  }
  func.func @transform_3(%arg0: i32) -> (i32, i32, i32) {
    %c0_i32 = arith.constant 0 : i32
    %c0_i32_0 = arith.constant 0 : i32
    %c0_i32_1 = arith.constant 0 : i32
    return %arg0, %c0_i32, %c0_i32_0 : i32, i32, i32
  }
}

</mosaic_0001>

<bundles_post_ra>
// kernel: tile.18
= control target key start
LH: loop header
LB: loop body
LE: loop exit
PB: predicated region body
PF: predicated region fallthrough
CT: control target
= control target key end

     0   :  { %s22_s0 = inlined_call_operand.vmem [shape: f32[8], index: 0, kind: input, shape index: {}]   ;;  %s23_s1 = inlined_call_operand.vmem [shape: f32[4,8], index: 1, kind: output, shape index: {}]  }
   0x1   :  { %v4_v0 = vld [vmem:[%s22_s0] ss:$0 sm:$0xff] }
   0x2   :  { %5 = vst [vmem:[%s23_s1] sm:$0xf] %v4_v0 }

// kernel: up_conv_forward.1
= control target key start
LH: loop header
LB: loop body
LE: loop exit
PB: predicated region body
PF: predicated region fallthrough
CT: control target
= control target key end

     0   :  { %s2041_s12 = smov 0   ;;  %s3662_s0 = inlined_call_operand.vmem [shape: f32[2,18,18,4], index: 0, kind: input, shape index: {}]   ;;  %s3663_s1 = inlined_call_operand.vmem [shape: f32[32,36], index: 1, kind: input, shape index: {}]   ;;  %s3664_s2 = inlined_call_operand.vmem [shape: f32[2,32,256], index: 2, kind: output, shape index: {0}]   ;;  %s3665_s3 = inlined_call_operand.vmem [shape: f32[2,32,2], index: 3, kind: output, shape index: {1}]  }
   0x1 LB: > { %s1846_s13 = sadd.s32 4294967295, %s2011_s12   ;;  %p1850_p0 = scmp.ge.s32.totalorder %s2011_s12, 1  ;;  %s2011_s12 = sphi %s2041_s12, %s14_s12  }
   0x2   : > { %p140_p1 = scmp.lt.s32.totalorder %s2011_s12, 3 }
   0x4   : > { %p141_p2 = pnand %p1850_p0, %p140_p1 }
   0x6   : > { %144 = sbr.rel (%p141_p2) target bundleno = 1003 (0x3eb), region = 28 }
   0xb   : > { %p169_p3 = scmp.lt.s32.totalorder %s1846_s13, 1  ;;  %vm286_vm0 = vcmask 1046528   ;;  %s2013_s18 = smov 4   ;;  %vm463_vm1 = vcmask 1045504   ;;  %vm1242_vm2 = vcmask 31744   ;;  %vm1275_vm3 = vcmask 64512  }
   0xc   : > { %s2014_s19 = smov 8   ;;  %s2015_s20 = smov 12   ;;  %vm1341_vm4 = vcmask 130048   ;;  %vm1308_vm5 = vcmask 97280   ;;  %vm1374_vm6 = vcmask 162816   ;;  %vm1407_vm7 = vcmask 195584  }
   0xd   : > { %s3988_s13 = smov (!%p169_p3, %s1846_s13), 1  ;;  %s2016_s21 = smov 16   ;;  %vm1440_vm8 = vcmask 228352   ;;  %vm1473_vm9 = vcmask 261120   ;;  %vm1510_vm10 = vcmask 293888   ;;  %vm1748_vm11 = vcmask 7168  }
   0xe   : > { %s1968_s14 = smul.u32 432, %s3988_s13  ;;  %s2017_s22 = smov 20   ;;  %vm1753_vm12 = vcmask 15360  }
   0xf   : > { %s2018_s23 = smov 24   ;;  %s2019_s24 = smov 28  }
  0x10   : > { %s2055_s17 = scalar_lea.vmem %s3662_s0, %s1968_s14  ;;  %s2020_s25 = smov 32  }
  0x11   : > { %v2058_v0 = vld [vmem:[%s2055_s17 + $0x18] sm:$0xff]  ;;  %v2061_v1 = vld [vmem:[%s2055_s17 + $0x20] sm:$0xff]  ;;  %v2069_v5 = vld [vmem:[%s2055_s17 + $0x8] sm:$0xff]  ;;  %s1894_s7 = sshll.u32 %s3988_s13, 6  ;;  %s1895_s11 = sshll.u32 %s3988_s13, 5 }
  0x12   : > { %v2064_v2 = vld [vmem:[%s2055_s17] sm:$0xff]  ;;  %v292_v3 = vrot.slane %v2058_v0, 1  ;;  %v293_v4 = vrot.slane %v2061_v1, 1  ;;  %v2073_v7 = vld [vmem:[%s2055_s17 + $0x28] sm:$0x3]  ;;  %v288_v8 = vrot.slane %v2069_v5, 1  ;;  %s178_s10 = scalar_lea.vmem %s3664_s2, %s1894_s7  ;;  %s183_s16 = scalar_lea.vmem %s3665_s3, %s1895_s11 }
  0x13   : > { %v287_v6 = vrot.slane %v2064_v2, 1  ;;  %v295_v9 = vrot.slane %v2073_v7, 1  ;;  %v2078_v10 = vld [vmem:[%s2055_s17 + $0x10] sm:$0x3]  ;;  %v2081_v11 = vld [vmem:[%s2055_s17 + $0x38] sm:$0xff]  ;;  %v2111_v24 = vld [vmem:[%s2055_s17 + $0x48] sm:$0xff] }
  0x14   : > { %v2084_v12 = vsel %vm286_vm0, %v292_v3, %v293_v4  ;;  %v290_v13 = vrot.slane %v2078_v10, 1  ;;  %v2088_v14 = vld [vmem:[%s2055_s17 + $0x40] sm:$0x3]  ;;  %v2091_v15 = vld [vmem:[%s2055_s17 + $0x30] sm:$0xff]  ;;  %v298_v18 = vrot.slane %v2081_v11, 1  ;;  %v302_v29 = vrot.slane %v2111_v24, 1 }
  0x15   : > { %3789 = vst [vmem:[#allocation2_spill] sm:$0xff] %v2084_v12  ;;  %371 = vrot.lane.b32.xlu1 %v2084_v12, %s2013_s18  ;;  %v289_v16 = vsel %vm286_vm0, %v287_v6, %v288_v8  ;;  %v2098_v17 = vsel %vm286_vm0, %v293_v4, %v295_v9  ;;  %v300_v19 = vrot.slane %v2088_v14, 1  ;;  %v297_v21 = vrot.slane %v2091_v15, 1  ;;  %v2105_v22 = vld [vmem:[%s2055_s17 + $0x50] sm:$0xff]  ;;  %v2108_v23 = vld [vmem:[%s2055_s17 + $0x58] sm:$0x3] }
  0x16   : > { %367 = vrot.lane.b32.xlu0 %v289_v16, %s2013_s18  ;;  %3790 = vst [vmem:[#allocation3_spill] sm:$0xff] %v2098_v17  ;;  %v291_v20 = vsel %vm286_vm0, %v288_v8, %v290_v13  ;;  %v303_v26 = vrot.slane %v2105_v22, 1  ;;  %v305_v27 = vrot.slane %v2108_v23, 1  ;;  %v2126_v30 = vld [vmem:[%s2055_s17 + $0x68] sm:$0xff]  ;;  %v2129_v31 = vld [vmem:[%s2055_s17 + $0x70] sm:$0x3] }
  0x17   : > { %v2117_v25 = vsel %vm286_vm0, %v298_v18, %v300_v19  ;;  %v2122_v28 = vsel %vm286_vm0, %v297_v21, %v298_v18  ;;  %v2132_v32 = vld [vmem:[%s2055_s17 + $0x60] sm:$0xff]  ;;  %v308_v34 = vrot.slane %v2126_v30, 1  ;;  %v310_v35 = vrot.slane %v2129_v31, 1  ;;  %v2151_v39 = vld [vmem:[%s2055_s17 + $0x88] sm:$0x3]  ;;  %v2154_v40 = vld [vmem:[%s2055_s17 + $0x78] sm:$0xff] }
  0x18   : > { %3791 = vst [vmem:[#allocation4_spill] sm:$0xff] %v2117_v25  ;;  %3792 = vst [vmem:[#allocation5_spill] sm:$0xff] %v2122_v28  ;;  %v2139_v33 = vsel %vm286_vm0, %v303_v26, %v305_v27  ;;  %v2144_v36 = vsel %vm286_vm0, %v302_v29, %v303_v26  ;;  %v307_v37 = vrot.slane %v2132_v32, 1  ;;  %v2148_v38 = vld [vmem:[%s2055_s17 + $0x80] sm:$0xff]  ;;  %v315_v43 = vrot.slane %v2151_v39, 1  ;;  %v2170_v46 = vld [vmem:[%s2055_s17 + $0x98] sm:$0xff] }
  0x19   : > { %373 = vrot.lane.b32.xlu1 %v2098_v17, %s2013_s18  ;;  %3793 = vst [vmem:[#allocation6_spill] sm:$0xff] %v2139_v33  ;;  %3794 = vst [vmem:[#allocation7_spill] sm:$0xff] %v2144_v36  ;;  %v2161_v41 = vsel %vm286_vm0, %v308_v34, %v310_v35  ;;  %v313_v42 = vrot.slane %v2148_v38, 1  ;;  %v312_v45 = vrot.slane %v2154_v40, 1  ;;  %v2173_v47 = vld [vmem:[%s2055_s17 + $0xa0] sm:$0x3] }
  0x1a   : > { %369 = vrot.lane.b32.xlu0 %v291_v20, %s2013_s18  ;;  %3795 = vst [vmem:[#allocation8_spill] sm:$0xff] %v2161_v41  ;;  %v2166_v44 = vsel %vm286_vm0, %v307_v37, %v308_v34  ;;  %3797 = vst [vmem:[#allocation10_spill] sm:$0xff] %v2170_v46  ;;  %v2176_v48 = vld [vmem:[%s2055_s17 + $0x90] sm:$0xff]  ;;  %v318_v50 = vrot.slane %v2170_v46, 1  ;;  %v320_v51 = vrot.slane %v2173_v47, 1  ;;  %v2198_v56 = vld [vmem:[%s2055_s17 + $0xa8] sm:$0xff] }
  0x1b   : > { %3796 = vst [vmem:[#allocation9_spill] sm:$0xff] %v2166_v44  ;;  %v2183_v49 = vsel %vm286_vm0, %v313_v42, %v315_v43  ;;  %v2188_v52 = vsel %vm286_vm0, %v312_v45, %v313_v42  ;;  %v317_v53 = vrot.slane %v2176_v48, 1  ;;  %v2192_v54 = vld [vmem:[%s2055_s17 + $0xb0] sm:$0xff]  ;;  %v2195_v55 = vld [vmem:[%s2055_s17 + $0xb8] sm:$0x3]  ;;  %v322_v61 = vrot.slane %v2198_v56, 1 }
  0x1c   : > { %3798 = vst [vmem:[#allocation11_spill] sm:$0xff] %v2183_v49  ;;  %3799 = vst [vmem:[#allocation12_spill] sm:$0xff] %v2188_v52  ;;  %v2205_v57 = vsel %vm286_vm0, %v318_v50, %v320_v51  ;;  %v323_v58 = vrot.slane %v2192_v54, 1  ;;  %v325_v59 = vrot.slane %v2195_v55, 1  ;;  %v2214_v62 = vld [vmem:[%s2055_s17 + $0xc8] sm:$0xff]  ;;  %v2220_v3 = vld [vmem:[%s2055_s17 + $0xc0] sm:$0xff] }
  0x1d   : > { %377 = vrot.lane.b32.xlu1 %v2117_v25, %s2013_s18  ;;  %3800 = vst [vmem:[#allocation13_spill] sm:$0xff] %v2205_v57  ;;  %v2210_v60 = vsel %vm286_vm0, %v317_v53, %v318_v50  ;;  %v2217_v63 = vld [vmem:[%s2055_s17 + $0xd0] sm:$0x3]  ;;  %v328_v6 = vrot.slane %v2214_v62, 1  ;;  %v327_v13 = vrot.slane %v2220_v3, 1  ;;  %v2236_v16 = vld [vmem:[%s2055_s17 + $0xe0] sm:$0xff] }
  0x1e   : > { %375 = vrot.lane.b32.xlu0 %v2122_v28, %s2013_s18  ;;  %3801 = vst [vmem:[#allocation14_spill] sm:$0xff] %v2210_v60  ;;  %v2227_v4 = vsel %vm286_vm0, %v323_v58, %v325_v59  ;;  %v330_v8 = vrot.slane %v2217_v63, 1  ;;  %v2232_v9 = vsel %vm286_vm0, %v322_v61, %v323_v58  ;;  %v2239_v18 = vld [vmem:[%s2055_s17 + $0xe8] sm:$0x3]  ;;  %v2242_v19 = vld [vmem:[%s2055_s17 + $0xd8] sm:$0xff]  ;;  %v333_v21 = vrot.slane %v2236_v16, 1 }
  0x1f   : > { %3802 = vst [vmem:[#allocation15_spill] sm:$0xff] %v2227_v4  ;;  %3803 = vst [vmem:[#allocation16_spill] sm:$0xff] %v2232_v9  ;;  %v335_v26 = vrot.slane %v2239_v18, 1  ;;  %v2254_v27 = vsel %vm286_vm0, %v327_v13, %v328_v6  ;;  %v332_v29 = vrot.slane %v2242_v19, 1  ;;  %v2258_v34 = vld [vmem:[%s2055_s17 + $0xf8] sm:$0xff]  ;;  %v2264_v37 = vld [vmem:[%s2055_s17 + $0xf0] sm:$0xff] }
  0x20   : > { %v2249_v20 = vsel %vm286_vm0, %v328_v6, %v330_v8  ;;  %3805 = vst [vmem:[#allocation18_spill] sm:$0xff] %v2254_v27  ;;  %v2261_v35 = vld [vmem:[%s2055_s17 + $0x100] sm:$0x3]  ;;  %3806 = vst [vmem:[#allocation19_spill] sm:$0xff] %v2264_v37  ;;  %v338_v43 = vrot.slane %v2258_v34, 1  ;;  %v2276_v50 = vld [vmem:[%s2055_s17 + $0x110] sm:$0xff] }
  0x21   : > { %381 = vrot.lane.b32.xlu1 %v2139_v33, %s2013_s18  ;;  %3804 = vst [vmem:[#allocation17_spill] sm:$0xff] %v2249_v20  ;;  %v2271_v42 = vsel %vm286_vm0, %v333_v21, %v335_v26  ;;  %v340_v45 = vrot.slane %v2261_v35, 1  ;;  %3808 = vst [vmem:[#allocation21_spill] sm:$0xff] %v2276_v50  ;;  %v2279_v51 = vld [vmem:[%s2055_s17 + $0x188] sm:$0xff]  ;;  %v2282_v53 = vsel %vm286_vm0, %v332_v29, %v333_v21  ;;  %v337_v58 = vrot.slane %v2264_v37, 1  ;;  %v2293_v8 = vld [vmem:[%s2055_s17 + $0x1a0] sm:$0xff] }
  0x22   : > { %379 = vrot.lane.b32.xlu0 %v2144_v36, %s2013_s18  ;;  %3807 = vst [vmem:[#allocation20_spill] sm:$0xff] %v2271_v42  ;;  %3809 = vst [vmem:[#allocation22_spill] sm:$0xff] %v2282_v53  ;;  %v2286_v59 = vld [vmem:[%s2055_s17 + $0x118] sm:$0x3]  ;;  %v234_v61 = vld [vmem:[%s2055_s17 + $0x190] sm:$0x3] }
  0x23   : > { %v2290_v6 = vld [vmem:[%s2055_s17 + $0x108] sm:$0xff]  ;;  %3811 = vst [vmem:[#allocation24_spill] sm:$0xff] %v2293_v8  ;;  %v343_v13 = vrot.slane %v2276_v50, 1  ;;  %v740_v21 = vrot.slane %v2279_v51, 1  ;;  %v2303_v29 = vsel %vm286_vm0, %v338_v43, %v340_v45  ;;  %v345_v12 = vrot.slane %v2286_v59, 1 }
  0x24   : > { %3810 = vst [vmem:[#allocation23_spill] sm:$0xff] %v2290_v6  ;;  %v237_v26 = vld [vmem:[%s2055_s17 + $0x1a8] sm:$0x3]  ;;  %3812 = vst [vmem:[#allocation25_spill] sm:$0xff] %v2303_v29  ;;  %v742_v28 = vrot.slane %v234_v61, 1  ;;  %v841_v25 = vrot.slane %v2279_v51, 2  ;;  %v2311_v36 = vsel %vm286_vm0, %v337_v58, %v338_v43 }
  0x25   : > { %385 = vrot.lane.b32.xlu1 %v2161_v41, %s2013_s18  ;;  %v2307_v17 = vld [vmem:[%s2055_s17 + $0x128] sm:$0xff]  ;;  %3814 = vst [vmem:[#allocation27_spill] sm:$0xff] %v2311_v36  ;;  %v342_v33 = vrot.slane %v2290_v6, 1  ;;  %v843_v41 = vrot.slane %v234_v61, 2  ;;  %v1041_v45 = vrot.slane %v2293_v8, 1  ;;  %v1043_v43 = vrot.slane %v237_v26, 1 }
  0x26   : > { %383 = vrot.lane.b32.xlu0 %v2166_v44, %s2013_s18  ;;  %3813 = vst [vmem:[#allocation26_spill] sm:$0xff] %v2307_v17  ;;  %v2315_v44 = vld [vmem:[%s2055_s17 + $0x130] sm:$0x3]  ;;  %v348_v61 = vrot.slane %v2307_v17, 1 }
  0x29   : > { %389 = vrot.lane.b32.xlu1 %v2183_v49, %s2013_s18  ;;  %v2322_v49 = vld [vmem:[%s2055_s17 + $0x120] sm:$0xff] }
  0x2a   : > { %387 = vrot.lane.b32.xlu0 %v2188_v52, %s2013_s18  ;;  %v2318_v52 = vld [vmem:[%s2055_s17 + $0x180] sm:$0xff]  ;;  %3816 = vst [vmem:[#allocation29_spill] sm:$0xff] %v2322_v49 }
  0x2b   : > { %3815 = vst [vmem:[#allocation28_spill] sm:$0xff] %v2318_v52  ;;  %v739_v58 = vrot.slane %v2318_v52, 1 }
  0x2d   : > { %393 = vrot.lane.b32.xlu1 %v2205_v57, %s2013_s18  ;;  %v1142_v57 = vrot.slane %v2293_v8, 2 }
  0x2e   : > { %391 = vrot.lane.b32.xlu0 %v2210_v60, %s2013_s18  ;;  %v2325_v60 = vsel %vm286_vm0, %v740_v21, %v742_v28  ;;  %v840_v28 = vrot.slane %v2318_v52, 2  ;;  %v2410_v52 = vld [vmem:[%s2055_s17 + $0x178] sm:$0x3] }
  0x2f   : > { %3817 = vst [vmem:[#allocation30_spill] sm:$0xff] %v2325_v60 }
  0x31   : > { %397 = vrot.lane.b32.xlu1 %v2227_v4, %s2013_s18  ;;  %v1144_v4 = vrot.slane %v237_v26, 2  ;;  %v347_v26 = vrot.slane %v2322_v49, 1 }
  0x32   : > { %395 = vrot.lane.b32.xlu0 %v2232_v9, %s2013_s18  ;;  %v2333_v9 = vsel %vm463_vm1, %v841_v25, %v843_v41  ;;  %v2349_v41 = vsel %vm286_vm0, %v342_v33, %v343_v13 }
  0x33   : > { %3818 = vst [vmem:[#allocation31_spill] sm:$0xff] %v2333_v9  ;;  %3822 = vst [vmem:[#allocation35_spill] sm:$0xff] %v2349_v41  ;;  %v2359_v8 = vsel %vm463_vm1, %v1142_v57, %v1144_v4  ;;  %v2413_v9 = vld [vmem:[%s2055_s17 + $0x168] sm:$0xff] }
  0x34   : > { %3824 = vst [vmem:[#allocation37_spill] sm:$0xff] %v2359_v8 }
  0x35   : > { %401 = vrot.lane.b32.xlu1 %v2249_v20, %s2013_s18  ;;  %v362_v20 = vrot.slane %v2413_v9, 1 }
  0x36   : > { %399 = vrot.lane.b32.xlu0 %v2254_v27, %s2013_s18  ;;  %v350_v27 = vrot.slane %v2315_v44, 1 }
  0x38   : > { %v2372_v33 = vsel %vm286_vm0, %v348_v61, %v350_v27  ;;  %v2392_v27 = vld [vmem:[%s2055_s17 + $0x198] sm:$0xff] }
  0x39   : > { %405 = vrot.lane.b32.xlu1 %v2271_v42, %s2013_s18  ;;  %v2343_v42 = vsel %vm286_vm0, %v1041_v45, %v1043_v43  ;;  %v2362_v43 = vsel %vm463_vm1, %v840_v28, %v841_v25  ;;  %3827 = vst [vmem:[#allocation40_spill] sm:$0xff] %v2372_v33  ;;  %v2377_v25 = vsel %vm286_vm0, %v347_v26, %v348_v61  ;;  %v2381_v28 = vld [vmem:[%s2055_s17 + $0x158] sm:$0xff]  ;;  %v1040_v8 = vrot.slane %v2392_v27, 1 }
  0x3a   : > { %403 = vrot.lane.b32.xlu0 %v2282_v53, %s2013_s18  ;;  %v2339_v53 = vsel %vm286_vm0, %v343_v13, %v345_v12  ;;  %3820 = vst [vmem:[#allocation33_spill] sm:$0xff] %v2343_v42  ;;  %v2356_v12 = vld [vmem:[%s2055_s17 + $0x148] sm:$0x3]  ;;  %3825 = vst [vmem:[#allocation38_spill] sm:$0xff] %v2362_v43  ;;  %v358_v26 = vrot.slane %v2381_v28, 1 }
  0x3b   : > { %3819 = vst [vmem:[#allocation32_spill] sm:$0xff] %v2339_v53  ;;  %v355_v4 = vrot.slane %v2356_v12, 1  ;;  %3828 = vst [vmem:[#allocation41_spill] sm:$0xff] %v2377_v25 }
  0x3c   : > { %3829 = vst [vmem:[#allocation42_spill] sm:$0xff] %v2381_v28 }
  0x3d   : > { %409 = vrot.lane.b32.xlu1 %v2303_v29, %s2013_s18  ;;  %v2346_v29 = vsel %vm286_vm0, %v739_v58, %v740_v21  ;;  %v2365_v21 = vld [vmem:[%s2055_s17 + $0x138] sm:$0xff] }
  0x3e   : > { %407 = vrot.lane.b32.xlu0 %v2311_v36, %s2013_s18  ;;  %3821 = vst [vmem:[#allocation34_spill] sm:$0xff] %v2346_v29  ;;  %v2353_v36 = vld [vmem:[%s2055_s17 + $0x140] sm:$0xff]  ;;  %3826 = vst [vmem:[#allocation39_spill] sm:$0xff] %v2365_v21  ;;  %v352_v58 = vrot.slane %v2365_v21, 1 }
  0x3f   : > { %3823 = vst [vmem:[#allocation36_spill] sm:$0xff] %v2353_v36  ;;  %v353_v13 = vrot.slane %v2353_v36, 1 }
  0x41   : > { %413 = vrot.lane.b32.xlu1 %v2339_v53, %s2013_s18  ;;  %v2384_v53 = vld [vmem:[%s2055_s17 + $0x160] sm:$0x3]  ;;  %v2397_v61 = vsel %vm286_vm0, %v353_v13, %v355_v4  ;;  %v2403_v29 = vsel %vm286_vm0, %v352_v58, %v353_v13  ;;  %v2418_v4 = vsel %vm286_vm0, %v1040_v8, %v1041_v45  ;;  %v1141_v8 = vrot.slane %v2392_v27, 2 }
  0x42   : > { %411 = vrot.lane.b32.xlu0 %v2349_v41, %s2013_s18  ;;  %v2387_v41 = vld [vmem:[%s2055_s17 + $0x150] sm:$0xff]  ;;  %3831 = vst [vmem:[#allocation44_spill] sm:$0xff] %v2397_v61  ;;  %v360_v43 = vrot.slane %v2384_v53, 1  ;;  %3832 = vst [vmem:[#allocation45_spill] sm:$0xff] %v2403_v29 }
  0x43   : > { %3830 = vst [vmem:[#allocation43_spill] sm:$0xff] %v2387_v41  ;;  %v357_v42 = vrot.slane %v2387_v41, 1 }
  0x44   : > { %v2423_v13 = vsel %vm286_vm0, %v358_v26, %v360_v43  ;;  %v465_v43 = vrot.slane %v2069_v5, 2 }
  0x45   : > { %417 = vrot.lane.b32.xlu1 %v2372_v33, %s2013_s18  ;;  %v2407_v33 = vld [vmem:[%s2055_s17 + $0x170] sm:$0xff]  ;;  %3833 = vst [vmem:[#allocation46_spill] sm:$0xff] %v2423_v13  ;;  %v2428_v60 = vsel %vm286_vm0, %v357_v42, %v358_v26  ;;  %v464_v26 = vrot.slane %v2064_v2, 2 }
  0x46   : > { %415 = vrot.lane.b32.xlu0 %v2377_v25, %s2013_s18  ;;  %v363_v58 = vrot.slane %v2407_v33, 1  ;;  %v365_v25 = vrot.slane %v2410_v52, 1  ;;  %3834 = vst [vmem:[#allocation47_spill] sm:$0xff] %v2428_v60 }
  0x48   : > { %v2437_v45 = vsel %vm286_vm0, %v363_v58, %v365_v25  ;;  %v2442_v42 = vsel %vm286_vm0, %v362_v20, %v363_v58  ;;  %v466_v20 = vsel %vm463_vm1, %v464_v26, %v465_v43  ;;  %v469_v58 = vrot.slane %v2058_v0, 2 }
  0x49   : > { %421 = vrot.lane.b32.xlu1 %v2397_v61, %s2013_s18  ;;  %v2448_v61 = vsel %vm463_vm1, %v1141_v8, %v1142_v57  ;;  %v475_v8 = vrot.slane %v2081_v11, 2  ;;  %v480_v26 = vrot.slane %v2105_v22, 2 }
  0x4a   : > { %419 = vrot.lane.b32.xlu0 %v2403_v29, %s2013_s18  ;;  %v467_v29 = vrot.slane %v2078_v10, 2  ;;  %v472_v10 = vrot.slane %v2073_v7, 2  ;;  %v474_v7 = vrot.slane %v2091_v15, 2 }
  0x4c   : > { %v468_v25 = vsel %vm463_vm1, %v465_v43, %v467_v29  ;;  %v477_v29 = vrot.slane %v2088_v14, 2  ;;  %v2478_v14 = vsel %vm463_vm1, %v474_v7, %v475_v8  ;;  %v490_v7 = vrot.slane %v2148_v38, 2 }
  0x4d   : > { %425 = vrot.lane.b32.xlu1 %v2423_v13, %s2013_s18  ;;  %3838 = vst [vmem:[#allocation51_spill] sm:$0xff] %v2478_v14 }
  0x4e   : > { %423 = vrot.lane.b32.xlu0 %v2428_v60, %s2013_s18  ;;  %v470_v60 = vrot.slane %v2061_v1, 2  ;;  %v2473_v43 = vsel %vm463_vm1, %v475_v8, %v477_v29  ;;  %v484_v8 = vrot.slane %v2132_v32, 2 }
  0x4f   : > { %3837 = vst [vmem:[#allocation50_spill] sm:$0xff] %v2473_v43 }
  0x50   : > { %v2460_v57 = vsel %vm463_vm1, %v470_v60, %v472_v10  ;;  %v2465_v13 = vsel %vm463_vm1, %v469_v58, %v470_v60  ;;  %v479_v60 = vrot.slane %v2111_v24, 2  ;;  %v487_v58 = vrot.slane %v2129_v31, 2 }
  0x51   : > { %429 = vrot.lane.b32.xlu1 %v2437_v45, %s2013_s18  ;;  %3835 = vst [vmem:[#allocation48_spill] sm:$0xff] %v2460_v57  ;;  %3836 = vst [vmem:[#allocation49_spill] sm:$0xff] %v2465_v13 }
  0x52   : > { %427 = vrot.lane.b32.xlu0 %v2442_v42, %s2013_s18 }
  0x55   : > { %546 = vrot.lane.b32.xlu1 %v468_v25, %s2014_s19  ;;  %v482_v25 = vrot.slane %v2108_v23, 2  ;;  %v2491_v23 = vsel %vm463_vm1, %v479_v60, %v480_v26 }
  0x56   : > { %544 = vrot.lane.b32.xlu0 %v466_v20, %s2014_s19  ;;  %v485_v20 = vrot.slane %v2126_v30, 2  ;;  %3840 = vst [vmem:[#allocation53_spill] sm:$0xff] %v2491_v23 }
  0x57   : > { %v2486_v10 = vsel %vm463_vm1, %v480_v26, %v482_v25  ;;  %v492_v25 = vrot.slane %v2151_v39, 2  ;;  %v489_v26 = vrot.slane %v2154_v40, 2 }
  0x58   : > { %3839 = vst [vmem:[#allocation52_spill] sm:$0xff] %v2486_v10  ;;  %v2499_v29 = vsel %vm463_vm1, %v485_v20, %v487_v58  ;;  %v2504_v31 = vsel %vm463_vm1, %v484_v8, %v485_v20  ;;  %v495_v58 = vrot.slane %v2170_v46, 2  ;;  %v494_v20 = vrot.slane %v2176_v48, 2  ;;  %v3866_v46 = vld [vmem:[#allocation31_spill] sm:$0xff] }
  0x59   : > { %550 = vrot.lane.b32.xlu1 %v2460_v57, %s2014_s19  ;;  %3841 = vst [vmem:[#allocation54_spill] sm:$0xff] %v2499_v29  ;;  %3842 = vst [vmem:[#allocation55_spill] sm:$0xff] %v2504_v31  ;;  %v2512_v60 = vsel %vm463_vm1, %v490_v7, %v492_v25  ;;  %v2517_v39 = vsel %vm463_vm1, %v489_v26, %v490_v7  ;;  %v500_v25 = vrot.slane %v2192_v54, 2  ;;  %v502_v57 = vrot.slane %v2195_v55, 2 }
  0x5a   : > { %548 = vrot.lane.b32.xlu0 %v2465_v13, %s2014_s19  ;;  %3843 = vst [vmem:[#allocation56_spill] sm:$0xff] %v2512_v60  ;;  %v497_v13 = vrot.slane %v2173_v47, 2  ;;  %3844 = vst [vmem:[#allocation57_spill] sm:$0xff] %v2517_v39  ;;  %v2530_v47 = vsel %vm463_vm1, %v494_v20, %v495_v58  ;;  %v499_v7 = vrot.slane %v2198_v56, 2 }
  0x5b   : > { %3846 = vst [vmem:[#allocation59_spill] sm:$0xff] %v2530_v47  ;;  %v2538_v26 = vsel %vm463_vm1, %v500_v25, %v502_v57  ;;  %v510_v57 = vrot.slane %v2236_v16, 2 }
  0x5c   : > { %v2525_v8 = vsel %vm463_vm1, %v495_v58, %v497_v13  ;;  %v505_v13 = vrot.slane %v2214_v62, 2  ;;  %v2543_v55 = vsel %vm463_vm1, %v499_v7, %v500_v25  ;;  %v504_v58 = vrot.slane %v2220_v3, 2 }
  0x5d   : > { %554 = vrot.lane.b32.xlu1 %v2473_v43, %s2014_s19  ;;  %3845 = vst [vmem:[#allocation58_spill] sm:$0xff] %v2525_v8  ;;  %3847 = vst [vmem:[#allocation60_spill] sm:$0xff] %v2543_v55  ;;  %v512_v43 = vrot.slane %v2239_v18, 2  ;;  %v509_v25 = vrot.slane %v2242_v19, 2 }
  0x5e   : > { %552 = vrot.lane.b32.xlu0 %v2478_v14, %s2014_s19  ;;  %v507_v14 = vrot.slane %v2217_v63, 2  ;;  %v2556_v63 = vsel %vm463_vm1, %v504_v58, %v505_v13 }
  0x5f   : > { %3849 = vst [vmem:[#allocation62_spill] sm:$0xff] %v2556_v63  ;;  %v2564_v7 = vsel %vm463_vm1, %v510_v57, %v512_v43  ;;  %v2569_v18 = vsel %vm463_vm1, %v509_v25, %v510_v57  ;;  %v520_v43 = vrot.slane %v2276_v50, 2  ;;  %v519_v57 = vrot.slane %v2290_v6, 2 }
  0x60   : > { %v2551_v20 = vsel %vm463_vm1, %v505_v13, %v507_v14  ;;  %3850 = vst [vmem:[#allocation63_spill] sm:$0xff] %v2564_v7  ;;  %v515_v14 = vrot.slane %v2258_v34, 2  ;;  %v514_v13 = vrot.slane %v2264_v37, 2  ;;  %v3878_v37 = vld [vmem:[#allocation18_spill] sm:$0xff] }
  0x61   : > { %558 = vrot.lane.b32.xlu1 %v2486_v10, %s2014_s19  ;;  %3848 = vst [vmem:[#allocation61_spill] sm:$0xff] %v2551_v20  ;;  %v522_v10 = vrot.slane %v2286_v59, 2  ;;  %v2595_v59 = vsel %vm463_vm1, %v519_v57, %v520_v43 }
  0x62   : > { %556 = vrot.lane.b32.xlu0 %v2491_v23, %s2014_s19  ;;  %v517_v23 = vrot.slane %v2261_v35, 2  ;;  %v2582_v35 = vsel %vm463_vm1, %v514_v13, %v515_v14  ;;  %3854 = vst [vmem:[#allocation67_spill] sm:$0xff] %v2595_v59 }
  0x63   : > { %3852 = vst [vmem:[#allocation65_spill] sm:$0xff] %v2582_v35  ;;  %v2590_v25 = vsel %vm463_vm1, %v520_v43, %v522_v10  ;;  %v530_v10 = vrot.slane %v2353_v36, 2  ;;  %v529_v43 = vrot.slane %v2365_v21, 2  ;;  %v3867_v21 = vld [vmem:[#allocation28_spill] sm:$0xff] }
  0x64   : > { %v2577_v58 = vsel %vm463_vm1, %v515_v14, %v517_v23  ;;  %3853 = vst [vmem:[#allocation66_spill] sm:$0xff] %v2590_v25  ;;  %v525_v23 = vrot.slane %v2307_v17, 2  ;;  %v524_v14 = vrot.slane %v2322_v49, 2  ;;  %v3868_v36 = vld [vmem:[#allocation24_spill] sm:$0xff] }
  0x65   : > { %562 = vrot.lane.b32.xlu1 %v2499_v29, %s2014_s19  ;;  %3851 = vst [vmem:[#allocation64_spill] sm:$0xff] %v2577_v58 }
  0x66   : > { %560 = vrot.lane.b32.xlu0 %v2504_v31, %s2014_s19  ;;  %v527_v31 = vrot.slane %v2315_v44, 2  ;;  %v2608_v44 = vsel %vm463_vm1, %v524_v14, %v525_v23 }
  0x67   : > { %3856 = vst [vmem:[#allocation69_spill] sm:$0xff] %v2608_v44 }
  0x68   : > { %v2603_v13 = vsel %vm463_vm1, %v525_v23, %v527_v31  ;;  %v535_v31 = vrot.slane %v2381_v28, 2  ;;  %v534_v23 = vrot.slane %v2387_v41, 2  ;;  %v3869_v28 = vld [vmem:[#allocation33_spill] sm:$0xff] }
  0x69   : > { %566 = vrot.lane.b32.xlu1 %v2512_v60, %s2014_s19  ;;  %3855 = vst [vmem:[#allocation68_spill] sm:$0xff] %v2603_v13 }
  0x6a   : > { %564 = vrot.lane.b32.xlu0 %v2517_v39, %s2014_s19 }
  0x6d   : > { %570 = vrot.lane.b32.xlu1 %v2525_v8, %s2014_s19  ;;  %v3864_v8 = vld [vmem:[#allocation17_spill] sm:$0xff] }
  0x6e   : > { %568 = vrot.lane.b32.xlu0 %v2530_v47, %s2014_s19 }
  0x71   : > { %574 = vrot.lane.b32.xlu1 %v2538_v26, %s2014_s19 }
  0x72   : > { %572 = vrot.lane.b32.xlu0 %v2543_v55, %s2014_s19  ;;  %v3876_v55 = vld [vmem:[#allocation20_spill] sm:$0xff] }
  0x75   : > { %578 = vrot.lane.b32.xlu1 %v2551_v20, %s2014_s19 }
  0x76   : > { %576 = vrot.lane.b32.xlu0 %v2556_v63, %s2014_s19 }
  0x79   : > { %582 = vrot.lane.b32.xlu1 %v2564_v7, %s2014_s19 }
  0x7a   : > { %580 = vrot.lane.b32.xlu0 %v2569_v18, %s2014_s19 }
  0x7d   : > { %586 = vrot.lane.b32.xlu1 %v2577_v58, %s2014_s19  ;;  %v537_v58 = vrot.slane %v2384_v53, 2  ;;  %v540_v53 = vrot.slane %v2407_v33, 2 }
  0x7e   : > { %584 = vrot.lane.b32.xlu0 %v2582_v35, %s2014_s19  ;;  %v532_v35 = vrot.slane %v2356_v12, 2  ;;  %v2623_v12 = vsel %vm463_vm1, %v529_v43, %v530_v10  ;;  %v539_v43 = vrot.slane %v2413_v9, 2 }
  0x7f   : > { %3858 = vst [vmem:[#allocation71_spill] sm:$0xff] %v2623_v12 }
  0x80   : > { %v2616_v57 = vsel %vm463_vm1, %v530_v10, %v532_v35  ;;  %v2633_v35 = vsel %vm463_vm1, %v535_v31, %v537_v58  ;;  %v2640_v10 = vsel %vm463_vm1, %v534_v23, %v535_v31 }
  0x81   : > { %590 = vrot.lane.b32.xlu1 %v2590_v25, %s2014_s19  ;;  %3857 = vst [vmem:[#allocation70_spill] sm:$0xff] %v2616_v57  ;;  %3859 = vst [vmem:[#allocation72_spill] sm:$0xff] %v2633_v35  ;;  %v542_v25 = vrot.slane %v2410_v52, 2  ;;  %v2655_v52 = vsel %vm463_vm1, %v539_v43, %v540_v53 }
  0x82   : > { %588 = vrot.lane.b32.xlu0 %v2595_v59, %s2014_s19  ;;  %3860 = vst [vmem:[#allocation73_spill] sm:$0xff] %v2640_v10 }
  0x83   : > { %v2650_v58 = vsel %vm463_vm1, %v540_v53, %v542_v25 }
  0x85   : > { %594 = vrot.lane.b32.xlu1 %v2603_v13, %s2014_s19 }
  0x86   : > { %592 = vrot.lane.b32.xlu0 %v2608_v44, %s2014_s19 }
  0x87   : > { %v2620_v59 = vpop.permute.xlu1 %371 }
  0x88   : > { %v2626_v14 = vpop.permute.xlu0 %367 }
  0x89   : > { %598 = vrot.lane.b32.xlu1 %v2616_v57, %s2014_s19 }
  0x8a   : > { %596 = vrot.lane.b32.xlu0 %v2623_v12, %s2014_s19 }
  0x8b   : > { %v2637_v44 = vpop.permute.xlu1 %373 }
  0x8c   : > { %v2643_v29 = vpop.permute.xlu0 %369 }
  0x8d   : > { %602 = vrot.lane.b32.xlu1 %v2633_v35, %s2014_s19  ;;  %v3865_v35 = vld [vmem:[#allocation30_spill] sm:$0xff] }
  0x8e   : > { %600 = vrot.lane.b32.xlu0 %v2640_v10, %s2014_s19 }
  0x8f   : > { %v2652_v13 = vpop.permute.xlu1 %377 }
  0x90   : > { %v2657_v31 = vpop.permute.xlu0 %375 }
  0x91   : > { %606 = vrot.lane.b32.xlu1 %v2650_v58, %s2014_s19 }
  0x92   : > { %604 = vrot.lane.b32.xlu0 %v2655_v52, %s2014_s19 }
  0x93   : > { %v2663_v23 = vpop.permute.xlu1 %381 }
  0x94   : > { %v2665_v39 = vpop.permute.xlu0 %379 }
  0x95   : > { %644 = vrot.lane.b32.xlu1 %v2061_v1, %s2015_s20 }
  0x96   : > { %642 = vrot.lane.b32.xlu0 %v2058_v0, %s2015_s20 }
  0x97   : > { %v2671_v25 = vpop.permute.xlu1 %385 }
  0x98   : > { %v2673_v53 = vpop.permute.xlu0 %383 }
  0x99   : > { %648 = vrot.lane.b32.xlu1 %v2081_v11, %s2015_s20 }
  0x9a   : > { %646 = vrot.lane.b32.xlu0 %v2091_v15, %s2015_s20 }
  0x9b   : > { %v2679_v43 = vpop.permute.xlu1 %389 }
  0x9c   : > { %v2681_v12 = vpop.permute.xlu0 %387 }
  0x9d   : > { %652 = vrot.lane.b32.xlu1 %v2105_v22, %s2015_s20 }
  0x9e   : > { %650 = vrot.lane.b32.xlu0 %v2111_v24, %s2015_s20 }
  0x9f   : > { %v2687_v60 = vpop.permute.xlu1 %393 }
  0xa0   : > { %3861 = vst [vmem:[#allocation74_spill] sm:$0xff] %v2687_v60  ;;  %v2689_v57 = vpop.permute.xlu0 %391 }
  0xa1   : > { %672 = vrot.lane.b32.xlu1 %v2214_v62, %s2015_s20 }
  0xa2   : > { %704 = vrot.lane.b32.xlu0 %v2279_v51, %s2015_s20 }
  0xa3   : > { %v2695_v47 = vpop.permute.xlu1 %397 }
  0xa4   : > { %3862 = vst [vmem:[#allocation75_spill] sm:$0xff] %v2695_v47  ;;  %v2697_v10 = vpop.permute.xlu0 %395 }
  0xa5   : > { %3863 = vst [vmem:[#allocation76_spill] sm:$0xff] %v2697_v10  ;;  %774 = vrot.lane.b32.xlu1 %v3864_v8, %s2016_s21 }
  0xa6   : > { %806 = vrot.lane.b32.xlu0 %v3865_v35, %s2016_s21 }
  0xa7   : > { %v2703_v60 = vpop.permute.xlu1 %401 }
  0xa8   : > { %v2705_v41 = vpop.permute.xlu0 %399 }
  0xa9   : > { %875 = vrot.lane.b32.xlu1 %v2551_v20, %s2017_s22 }
  0xaa   : > { %907 = vrot.lane.b32.xlu0 %v3866_v46, %s2017_s22 }
  0xab   : > { %v2711_v47 = vpop.permute.xlu1 %405 }
  0xac   : > { %v2713_v10 = vpop.permute.xlu0 %403 }
  0xad   : > { %702 = vrot.lane.b32.xlu1 %v3867_v21, %s2015_s20  ;;  %v3872_v21 = vld [vmem:[#allocation34_spill] sm:$0xff] }
  0xae   : > { %1005 = vrot.lane.b32.xlu0 %v3868_v36, %s2018_s23 }
  0xaf   : > { %v2719_v49 = vpop.permute.xlu1 %409 }
  0xb0   : > { %v2721_v17 = vpop.permute.xlu0 %407 }
  0xb1   : > { %1107 = vrot.lane.b32.xlu1 %v3869_v28, %s2019_s24  ;;  %v3875_v28 = vld [vmem:[#allocation37_spill] sm:$0xff] }
  0xb2   : > { %973 = vrot.lane.b32.xlu0 %v2236_v16, %s2018_s23 }
  0xb3   : > { %v2727_v6 = vpop.permute.xlu1 %413 }
  0xb4   : > { %3870 = vst [vmem:[#allocation17_spill] sm:$0xff] %v2727_v6  ;;  %v2729_v50 = vpop.permute.xlu0 %411 }
  0xb5   : > { %3871 = vst [vmem:[#allocation30_spill] sm:$0xff] %v2729_v50  ;;  %804 = vrot.lane.b32.xlu1 %v3872_v21, %s2016_s21  ;;  %v3877_v21 = vld [vmem:[#allocation38_spill] sm:$0xff] }
  0xb6   : > { %670 = vrot.lane.b32.xlu0 %v2220_v3, %s2015_s20 }
  0xb7   : > { %v2735_v36 = vpop.permute.xlu1 %417 }
  0xb8   : > { %3873 = vst [vmem:[#allocation31_spill] sm:$0xff] %v2735_v36  ;;  %v2737_v20 = vpop.permute.xlu0 %415 }
  0xb9   : > { %3874 = vst [vmem:[#allocation24_spill] sm:$0xff] %v2737_v20  ;;  %1208 = vrot.lane.b32.xlu1 %v3875_v28, %s2020_s25 }
  0xba   : > { %1075 = vrot.lane.b32.xlu0 %v3876_v55, %s2019_s24 }
  0xbb   : > { %v2743_v6 = vpop.permute.xlu1 %421 }
  0xbc   : > { %v2745_v50 = vpop.permute.xlu0 %419 }
  0xbd   : > { %905 = vrot.lane.b32.xlu1 %v3877_v21, %s2017_s22 }
  0xbe   : > { %772 = vrot.lane.b32.xlu0 %v3878_v37, %s2016_s21 }
  0xbf   : > { %v2751_v36 = vpop.permute.xlu1 %425 }
  0xc0   : > { %3879 = vst [vmem:[#allocation33_spill] sm:$0xff] %v2751_v36  ;;  %v2753_v20 = vpop.permute.xlu0 %423  ;;  %v1244_v36 = vsel %vm1242_vm2, %v2069_v5, %v2643_v29  ;;  %v1246_v5 = vsel %vm1242_vm2, %v2061_v1, %v2637_v44  ;;  %v1248_v1 = vsel %vm1242_vm2, %v2081_v11, %v2652_v13  ;;  %v1250_v11 = vsel %vm1242_vm2, %v2105_v22, %v2663_v23 }
  0xc1   : > { %873 = vrot.lane.b32.xlu1 %v2556_v63, %s2017_s22  ;;  %v1252_v22 = vsel %vm1242_vm2, %v2126_v30, %v2671_v25  ;;  %v1254_v30 = vsel %vm1242_vm2, %v2148_v38, %v2679_v43  ;;  %v1255_v43 = vsel %vm1242_vm2, %v2176_v48, %v2689_v57 }
  0xc2   : > { %1176 = vrot.lane.b32.xlu0 %v2564_v7, %s2020_s25  ;;  %v1243_v7 = vsel %vm1242_vm2, %v2064_v2, %v2626_v14  ;;  %v1245_v2 = vsel %vm1242_vm2, %v2058_v0, %v2620_v59  ;;  %v1247_v0 = vsel %vm1242_vm2, %v2091_v15, %v2657_v31  ;;  %v3887_v14 = vld [vmem:[#allocation22_spill] sm:$0xff]  ;;  %v1249_v15 = vsel %vm1242_vm2, %v2111_v24, %v2665_v39 }
  0xc3   : > { %v2759_v28 = vpop.permute.xlu1 %429  ;;  %v1251_v24 = vsel %vm1242_vm2, %v2132_v32, %v2673_v53  ;;  %v1253_v32 = vsel %vm1242_vm2, %v2154_v40, %v2681_v12 }
  0xc4   : > { %3880 = vst [vmem:[#allocation37_spill] sm:$0xff] %v2759_v28  ;;  %v2761_v55 = vpop.permute.xlu0 %427 }
  0xc5   : > { %3881 = vst [vmem:[#allocation38_spill] sm:$0xff] %v2761_v55  ;;  %700 = vrot.lane.b32.xlu1 %v2407_v33, %s2015_s20 }
  0xc6   : > { %1003 = vrot.lane.b32.xlu0 %v2392_v27, %s2018_s23 }
  0xc7   : > { %v547_v63 = vpop.permute.xlu1 %546 }
  0xc8   : > { %v2774_v28 = vsel %vm1275_vm3, %v1244_v36, %v547_v63  ;;  %v545_v55 = vpop.permute.xlu0 %544 }
  0xc9   : > { %3882 = vst [vmem:[#allocation77_spill] sm:$0xff] %v2774_v28  ;;  %v2777_v37 = vsel %vm1275_vm3, %v1243_v7, %v545_v55  ;;  %1105 = vrot.lane.b32.xlu1 %v2418_v4, %s2019_s24 }
  0xca   : > { %3883 = vst [vmem:[#allocation78_spill] sm:$0xff] %v2777_v37  ;;  %971 = vrot.lane.b32.xlu0 %v2242_v19, %s2018_s23  ;;  %v3924_v37 = vld [vmem:[#allocation47_spill] sm:$0xff] }
  0xcb   : > { %v551_v27 = vpop.permute.xlu1 %550 }
  0xcc   : > { %v2790_v29 = vsel %vm1275_vm3, %v1246_v5, %v551_v27  ;;  %v549_v55 = vpop.permute.xlu0 %548 }
  0xcd   : > { %3884 = vst [vmem:[#allocation79_spill] sm:$0xff] %v2790_v29  ;;  %v2793_v63 = vsel %vm1275_vm3, %v1245_v2, %v549_v55  ;;  %802 = vrot.lane.b32.xlu1 %v2437_v45, %s2016_s21 }
  0xce   : > { %3885 = vst [vmem:[#allocation80_spill] sm:$0xff] %v2793_v63  ;;  %668 = vrot.lane.b32.xlu0 %v2192_v54, %s2015_s20  ;;  %v3926_v63 = vld [vmem:[#allocation14_spill] sm:$0xff] }
  0xcf   : > { %v555_v4 = vpop.permute.xlu1 %554 }
  0xd0   : > { %v2806_v7 = vsel %vm1275_vm3, %v1248_v1, %v555_v4  ;;  %v553_v59 = vpop.permute.xlu0 %552 }
  0xd1   : > { %v2809_v44 = vsel %vm1275_vm3, %v1247_v0, %v553_v59  ;;  %1206 = vrot.lane.b32.xlu1 %v2448_v61, %s2020_s25  ;;  %v3888_v61 = vld [vmem:[#allocation15_spill] sm:$0xff] }
  0xd2   : > { %3886 = vst [vmem:[#allocation81_spill] sm:$0xff] %v2809_v44  ;;  %1073 = vrot.lane.b32.xlu0 %v3887_v14, %s2019_s24 }
  0xd3   : > { %v559_v13 = vpop.permute.xlu1 %558 }
  0xd4   : > { %v2822_v31 = vsel %vm1275_vm3, %v1250_v11, %v559_v13  ;;  %v557_v36 = vpop.permute.xlu0 %556 }
  0xd5   : > { %v2825_v5 = vsel %vm1275_vm3, %v1249_v15, %v557_v36  ;;  %903 = vrot.lane.b32.xlu1 %v2650_v58, %s2017_s22 }
  0xd6   : > { %770 = vrot.lane.b32.xlu0 %v3888_v61, %s2016_s21 }
  0xd7   : > { %v563_v23 = vpop.permute.xlu1 %562 }
  0xd8   : > { %v2838_v39 = vsel %vm1275_vm3, %v1252_v22, %v563_v23  ;;  %v561_v27 = vpop.permute.xlu0 %560 }
  0xd9   : > { %v2841_v2 = vsel %vm1275_vm3, %v1251_v24, %v561_v27  ;;  %871 = vrot.lane.b32.xlu1 %v2538_v26, %s2017_s22 }
  0xda   : > { %1174 = vrot.lane.b32.xlu0 %v2569_v18, %s2020_s25 }
  0xdb   : > { %v567_v25 = vpop.permute.xlu1 %566 }
  0xdc   : > { %v2854_v53 = vsel %vm1275_vm3, %v1254_v30, %v567_v25  ;;  %v565_v55 = vpop.permute.xlu0 %564  ;;  %v3896_v30 = vld [vmem:[#allocation60_spill] sm:$0xff]  ;;  %v3897_v25 = vld [vmem:[#allocation61_spill] sm:$0xff] }
  0xdd   : > { %v2857_v1 = vsel %vm1275_vm3, %v1253_v32, %v565_v55  ;;  %698 = vrot.lane.b32.xlu1 %v2413_v9, %s2015_s20  ;;  %v3898_v32 = vld [vmem:[#allocation17_spill] sm:$0xff] }
  0xde   : > { %1001 = vrot.lane.b32.xlu0 %v2279_v51, %s2018_s23  ;;  %v1260_v51 = vsel %vm1242_vm2, %v2214_v62, %v2703_v60 }
  0xdf   : > { %v2863_v4 = vpop.permute.xlu1 %570 }
  0xe0   : > { %v569_v40 = vpop.permute.xlu0 %568 }
  0xe1   : > { %v2869_v12 = vsel %vm1275_vm3, %v1255_v43, %v569_v40  ;;  %1103 = vrot.lane.b32.xlu1 %v3865_v35, %s2019_s24  ;;  %v1259_v35 = vsel %vm1242_vm2, %v2220_v3, %v2705_v41  ;;  %v1261_v41 = vsel %vm1242_vm2, %v2242_v19, %v2713_v10  ;;  %v3894_v19 = vld [vmem:[#allocation19_spill] sm:$0xff]  ;;  %v3900_v43 = vld [vmem:[#allocation30_spill] sm:$0xff] }
  0xe2   : > { %969 = vrot.lane.b32.xlu0 %v2214_v62, %s2018_s23  ;;  %v1262_v62 = vsel %vm1242_vm2, %v2236_v16, %v2711_v47  ;;  %v1264_v16 = vsel %vm1242_vm2, %v2258_v34, %v2719_v49  ;;  %v1263_v47 = vsel %vm1242_vm2, %v3894_v19, %v2721_v17  ;;  %v3899_v49 = vld [vmem:[#allocation21_spill] sm:$0xff]  ;;  %v3901_v17 = vld [vmem:[#allocation23_spill] sm:$0xff] }
  0xe3   : > { %v2875_v0 = vpop.permute.xlu1 %574  ;;  %v1266_v34 = vsel %vm1242_vm2, %v3899_v49, %v3898_v32  ;;  %v1265_v40 = vsel %vm1242_vm2, %v3901_v17, %v3900_v43  ;;  %v3907_v19 = vld [vmem:[#allocation29_spill] sm:$0xff]  ;;  %v3908_v49 = vld [vmem:[#allocation34_spill] sm:$0xff]  ;;  %v3910_v17 = vld [vmem:[#allocation39_spill] sm:$0xff] }
  0xe4   : > { %v2877_v59 = vpop.permute.xlu0 %572 }
  0xe5   : > { %800 = vrot.lane.b32.xlu1 %v2442_v42, %s2016_s21 }
  0xe6   : > { %666 = vrot.lane.b32.xlu0 %v2198_v56, %s2015_s20 }
  0xe7   : > { %v579_v57 = vpop.permute.xlu1 %578 }
  0xe8   : > { %v2890_v11 = vsel %vm1275_vm3, %v1260_v51, %v579_v57  ;;  %v577_v13 = vpop.permute.xlu0 %576 }
  0xe9   : > { %3889 = vst [vmem:[#allocation22_spill] sm:$0xff] %v2890_v11  ;;  %v2893_v15 = vsel %vm1275_vm3, %v1259_v35, %v577_v13  ;;  %1204 = vrot.lane.b32.xlu1 %v3866_v46, %s2020_s25  ;;  %v3893_v46 = vld [vmem:[#allocation16_spill] sm:$0xff]  ;;  %v3902_v13 = vld [vmem:[#allocation42_spill] sm:$0xff]  ;;  %v3925_v11 = vld [vmem:[#allocation73_spill] sm:$0xff] }
  0xea   : > { %3890 = vst [vmem:[#allocation15_spill] sm:$0xff] %v2893_v15  ;;  %1071 = vrot.lane.b32.xlu0 %v3864_v8, %s2019_s24 }
  0xeb   : > { %v583_v60 = vpop.permute.xlu1 %582 }
  0xec   : > { %v2906_v36 = vsel %vm1275_vm3, %v1262_v62, %v583_v60  ;;  %v581_v22 = vpop.permute.xlu0 %580  ;;  %v3903_v62 = vld [vmem:[#allocation28_spill] sm:$0xff]  ;;  %v3904_v60 = vld [vmem:[#allocation31_spill] sm:$0xff] }
  0xed   : > { %3891 = vst [vmem:[#allocation82_spill] sm:$0xff] %v2906_v36  ;;  %v2909_v23 = vsel %vm1275_vm3, %v1261_v41, %v581_v22  ;;  %901 = vrot.lane.b32.xlu1 %v2655_v52, %s2017_s22  ;;  %v3905_v41 = vld [vmem:[#allocation26_spill] sm:$0xff] }
  0xee   : > { %3892 = vst [vmem:[#allocation83_spill] sm:$0xff] %v2909_v23  ;;  %768 = vrot.lane.b32.xlu0 %v3893_v46, %s2016_s21  ;;  %v1268_v22 = vsel %vm1242_vm2, %v3905_v41, %v3904_v60 }
  0xef   : > { %v587_v8 = vpop.permute.xlu1 %586 }
  0xf0   : > { %v2922_v10 = vsel %vm1275_vm3, %v1264_v16, %v587_v8  ;;  %v585_v24 = vpop.permute.xlu0 %584  ;;  %v3906_v8 = vld [vmem:[#allocation24_spill] sm:$0xff] }
  0xf1   : > { %v2925_v27 = vsel %vm1275_vm3, %v1263_v47, %v585_v24  ;;  %869 = vrot.lane.b32.xlu1 %v3896_v30, %s2017_s22  ;;  %v1267_v47 = vsel %vm1242_vm2, %v3907_v19, %v3906_v8 }
  0xf2   : > { %3895 = vst [vmem:[#allocation16_spill] sm:$0xff] %v2925_v27  ;;  %1172 = vrot.lane.b32.xlu0 %v3897_v25, %s2020_s25 }
  0xf3   : > { %v591_v55 = vpop.permute.xlu1 %590 }
  0xf4   : > { %v2938_v51 = vsel %vm1275_vm3, %v1266_v34, %v591_v55  ;;  %v589_v57 = vpop.permute.xlu0 %588  ;;  %v3909_v34 = vld [vmem:[#allocation36_spill] sm:$0xff] }
  0xf5   : > { %v2941_v35 = vsel %vm1275_vm3, %v1265_v40, %v589_v57  ;;  %696 = vrot.lane.b32.xlu1 %v3902_v13, %s2015_s20  ;;  %v1270_v55 = vsel %vm1242_vm2, %v3909_v34, %v2743_v6  ;;  %v1269_v40 = vsel %vm1242_vm2, %v3910_v17, %v2745_v50  ;;  %v3913_v6 = vld [vmem:[#allocation43_spill] sm:$0xff] }
  0xf6   : > { %999 = vrot.lane.b32.xlu0 %v3903_v62, %s2018_s23  ;;  %v1271_v8 = vsel %vm1242_vm2, %v3913_v6, %v2753_v20 }
  0xf7   : > { %v595_v16 = vpop.permute.xlu1 %594 }
  0xf8   : > { %v2954_v24 = vsel %vm1275_vm3, %v1268_v22, %v595_v16  ;;  %v593_v25 = vpop.permute.xlu0 %592  ;;  %v3911_v22 = vld [vmem:[#allocation46_spill] sm:$0xff] }
  0xf9   : > { %v2957_v32 = vsel %vm1275_vm3, %v1267_v47, %v593_v25  ;;  %1101 = vrot.lane.b32.xlu1 %v3908_v49, %s2019_s24  ;;  %v3914_v47 = vld [vmem:[#allocation18_spill] sm:$0xff] }
  0xfa   : > { %967 = vrot.lane.b32.xlu0 %v2220_v3, %s2018_s23  ;;  %v3912_v3 = vld [vmem:[#allocation10_spill] sm:$0xff] }
  0xfb   : > { %v599_v43 = vpop.permute.xlu1 %598 }
  0xfc   : > { %v2970_v57 = vsel %vm1275_vm3, %v1270_v55, %v599_v43  ;;  %v597_v62 = vpop.permute.xlu0 %596  ;;  %v3915_v55 = vld [vmem:[#allocation72_spill] sm:$0xff]  ;;  %v3916_v43 = vld [vmem:[#allocation13_spill] sm:$0xff] }
  0xfd   : > { %v2973_v60 = vsel %vm1275_vm3, %v1269_v40, %v597_v62  ;;  %798 = vrot.lane.b32.xlu1 %v3911_v22, %s2016_s21  ;;  %v3919_v62 = vld [vmem:[#allocation58_spill] sm:$0xff] }
  0xfe   : > { %664 = vrot.lane.b32.xlu0 %v3912_v3, %s2015_s20 }
  0xff   : > { %v2979_v16 = vpop.permute.xlu1 %602 }
 0x100   : > { %v601_v50 = vpop.permute.xlu0 %600 }
 0x101   : > { %v2985_v19 = vsel %vm1275_vm3, %v1271_v8, %v601_v50  ;;  %1202 = vrot.lane.b32.xlu1 %v3877_v21, %s2020_s25  ;;  %v3920_v21 = vld [vmem:[#allocation62_spill] sm:$0xff] }
 0x102   : > { %1069 = vrot.lane.b32.xlu0 %v3914_v47, %s2019_s24 }
 0x103   : > { %v607_v25 = vpop.permute.xlu1 %606 }
 0x104   : > { %v2991_v49 = vpop.permute.xlu0 %604 }
 0x105   : > { %899 = vrot.lane.b32.xlu1 %v3915_v55, %s2017_s22 }
 0x106   : > { %766 = vrot.lane.b32.xlu0 %v3916_v43, %s2016_s21 }
 0x107   : > { %v2997_v20 = vpop.permute.xlu1 %644 }
 0x108   : > { %3917 = vst [vmem:[#allocation19_spill] sm:$0xff] %v2997_v20  ;;  %v2999_v40 = vpop.permute.xlu0 %642 }
 0x109   : > { %3918 = vst [vmem:[#allocation60_spill] sm:$0xff] %v2999_v40  ;;  %867 = vrot.lane.b32.xlu1 %v3919_v62, %s2017_s22 }
 0x10a   : > { %1170 = vrot.lane.b32.xlu0 %v3920_v21, %s2020_s25 }
 0x10b   : > { %v3005_v3 = vpop.permute.xlu1 %648 }
 0x10c   : > { %3921 = vst [vmem:[#allocation61_spill] sm:$0xff] %v3005_v3  ;;  %v3007_v8 = vpop.permute.xlu0 %646  ;;  %v3928_v3 = vld [vmem:[#allocation37_spill] sm:$0xff] }
 0x10d   : > { %3922 = vst [vmem:[#allocation17_spill] sm:$0xff] %v3007_v8  ;;  %694 = vrot.lane.b32.xlu1 %v3913_v6, %s2015_s20 }
 0x10e   : > { %997 = vrot.lane.b32.xlu0 %v2407_v33, %s2018_s23 }
 0x10f   : > { %v3013_v50 = vpop.permute.xlu1 %652 }
 0x110   : > { %v3015_v47 = vpop.permute.xlu0 %650 }
 0x111   : > { %3923 = vst [vmem:[#allocation21_spill] sm:$0xff] %v3015_v47  ;;  %1099 = vrot.lane.b32.xlu1 %v2437_v45, %s2019_s24 }
 0x112   : > { %965 = vrot.lane.b32.xlu0 %v2192_v54, %s2018_s23 }
 0x113   : > { %v673_v21 = vpop.permute.xlu1 %672 }
 0x114   : > { %v705_v15 = vpop.permute.xlu0 %704 }
 0x115   : > { %796 = vrot.lane.b32.xlu1 %v3924_v37, %s2016_s21 }
 0x116   : > { %662 = vrot.lane.b32.xlu0 %v2176_v48, %s2015_s20  ;;  %v3927_v48 = vld [vmem:[#allocation59_spill] sm:$0xff] }
 0x117   : > { %v775_v40 = vpop.permute.xlu1 %774 }
 0x118   : > { %v807_v28 = vpop.permute.xlu0 %806 }
 0x119   : > { %1200 = vrot.lane.b32.xlu1 %v2650_v58, %s2020_s25 }
 0x11a   : > { %1067 = vrot.lane.b32.xlu0 %v3888_v61, %s2019_s24  ;;  %v1274_v61 = vsel %vm1242_vm2, %v2407_v33, %v3928_v3 }
 0x11b   : > { %v876_v45 = vpop.permute.xlu1 %875  ;;  %v1307_v36 = vsel %vm1275_vm3, %v1274_v61, %v607_v25 }
 0x11c   : > { %v908_v20 = vpop.permute.xlu0 %907  ;;  %v1340_v44 = vsel %vm1308_vm5, %v1307_v36, %v705_v15 }
 0x11d   : > { %897 = vrot.lane.b32.xlu1 %v3925_v11, %s2017_s22  ;;  %v1373_v47 = vsel %vm1341_vm4, %v1340_v44, %v807_v28  ;;  %v3929_v44 = vld [vmem:[#allocation44_spill] sm:$0xff] }
 0x11e   : > { %764 = vrot.lane.b32.xlu0 %v3926_v63, %s2016_s21  ;;  %v1406_v33 = vsel %vm1374_vm6, %v1373_v47, %v908_v20  ;;  %v3930_v20 = vld [vmem:[#allocation75_spill] sm:$0xff] }
 0x11f   : > { %v703_v8 = vpop.permute.xlu1 %702 }
 0x120   : > { %v1006_v23 = vpop.permute.xlu0 %1005 }
 0x121   : > { %865 = vrot.lane.b32.xlu1 %v3927_v48, %s2017_s22  ;;  %v1439_v25 = vsel %vm1407_vm7, %v1406_v33, %v1006_v23 }
 0x122   : > { %1168 = vrot.lane.b32.xlu0 %v2538_v26, %s2020_s25 }
 0x123   : > { %v1108_v58 = vpop.permute.xlu1 %1107 }
 0x124   : > { %v974_v29 = vpop.permute.xlu0 %973  ;;  %v1472_v15 = vsel %vm1440_vm8, %v1439_v25, %v1108_v58 }
 0x125   : > { %692 = vrot.lane.b32.xlu1 %v3909_v34, %s2015_s20 }
 0x126   : > { %995 = vrot.lane.b32.xlu0 %v2413_v9, %s2018_s23 }
 0x127   : > { %v805_v26 = vpop.permute.xlu1 %804 }
 0x128   : > { %v3047_v27 = vpop.permute.xlu0 %670 }
 0x129   : > { %1097 = vrot.lane.b32.xlu1 %v2442_v42, %s2019_s24  ;;  %v1258_v42 = vsel %vm1242_vm2, %v2192_v54, %v3930_v20 }
 0x12a   : > { %963 = vrot.lane.b32.xlu0 %v2198_v56, %s2018_s23  ;;  %v1291_v56 = vsel %vm1275_vm3, %v1258_v42, %v2875_v0 }
 0x12b   : > { %v1209_v36 = vpop.permute.xlu1 %1208  ;;  %v1324_v47 = vsel %vm1308_vm5, %v1291_v56, %v673_v21 }
 0x12c   : > { %v1076_v3 = vpop.permute.xlu0 %1075  ;;  %v1505_v28 = vsel %vm1473_vm9, %v1472_v15, %v1209_v36  ;;  %v1357_v61 = vsel %vm1341_vm4, %v1324_v47, %v775_v40  ;;  %v3931_v15 = vld [vmem:[#allocation70_spill] sm:$0xff]  ;;  %v3932_v40 = vld [vmem:[#allocation11_spill] sm:$0xff] }
 0x12d   : > { %794 = vrot.lane.b32.xlu1 %v3929_v44, %s2016_s21  ;;  %1896 = vmatprep.subr.msk.mxu0 %vm1510_vm10, %v1505_v28  ;;  %v1390_v33 = vsel %vm1374_vm6, %v1357_v61, %v876_v45 }
 0x12e   : > { %660 = vrot.lane.b32.xlu0 %v2148_v38, %s2015_s20  ;;  %1936 = vmatprep.subr.msk.mxu1 %vm1510_vm10, %v1505_v28  ;;  %v1423_v38 = vsel %vm1407_vm7, %v1390_v33, %v974_v29  ;;  %v3933_v29 = vld [vmem:[#allocation56_spill] sm:$0xff] }
 0x12f   : > { %v906_v23 = vpop.permute.xlu1 %905  ;;  %v1456_v25 = vsel %vm1440_vm8, %v1423_v38, %v1076_v3  ;;  %v3934_v3 = vld [vmem:[#allocation38_spill] sm:$0xff] }
 0x130   : > { %v773_v58 = vpop.permute.xlu0 %772  ;;  %v1273_v28 = vsel %vm1242_vm2, %v2413_v9, %v3934_v3 }
 0x131   : > { %1198 = vrot.lane.b32.xlu1 %v2655_v52, %s2020_s25  ;;  %v1306_v20 = vsel %vm1275_vm3, %v1273_v28, %v2991_v49  ;;  %v1985_v49 = vld [vmem:[%s2055_s17 + $0x98] sm:$0xff] }
 0x132   : > { %1065 = vrot.lane.b32.xlu0 %v3893_v46, %s2019_s24  ;;  %v1339_v42 = vsel %vm1308_vm5, %v1306_v20, %v703_v8 }
 0x133   : > { %v874_v54 = vpop.permute.xlu1 %873 }
 0x134   : > { %v1177_v0 = vpop.permute.xlu0 %1176 }
 0x135   : > { %895 = vrot.lane.b32.xlu1 %v3931_v15, %s2017_s22  ;;  %v1489_v21 = vsel %vm1473_vm9, %v1456_v25, %v1177_v0  ;;  %v3936_v25 = vld [vmem:[#allocation76_spill] sm:$0xff]  ;;  %v3116_v0 = vld [vmem:[%s2055_s17 + $0x78] sm:$0xff] }
 0x136   : > { %762 = vrot.lane.b32.xlu0 %v3932_v40, %s2016_s21  ;;  %1897 = vmatpush3.xpose.msk.msra.mxu0 %vm1510_vm10, %v1489_v21 }
 0x137   : > { %1952 = vmatpush3.xpose.msk.msra.mxu1 %vm1510_vm10, %v1489_v21  ;;  %v701_v52 = vpop.permute.xlu1 %700 }
 0x138   : > { %v1004_v46 = vpop.permute.xlu0 %1003 }
 0x139   : > { %863 = vrot.lane.b32.xlu1 %v3933_v29, %s2017_s22 }
 0x13a   : > { %1166 = vrot.lane.b32.xlu0 %v3896_v30, %s2020_s25  ;;  %v1372_v30 = vsel %vm1341_vm4, %v1339_v42, %v805_v26  ;;  %v3935_v26 = vld [vmem:[#allocation45_spill] sm:$0xff] }
 0x13b   : > { %v1106_v45 = vpop.permute.xlu1 %1105  ;;  %v1405_v9 = vsel %vm1374_vm6, %v1372_v30, %v906_v23  ;;  %v1986_v23 = vld [vmem:[%s2055_s17 + $0xa8] sm:$0xff] }
 0x13c   : > { %v972_v36 = vpop.permute.xlu0 %971 }
 0x13d   : > { %690 = vrot.lane.b32.xlu1 %v3910_v17, %s2015_s20  ;;  %v1438_v17 = vsel %vm1407_vm7, %v1405_v9, %v1004_v46 }
 0x13e   : > { %993 = vrot.lane.b32.xlu0 %v3902_v13, %s2018_s23  ;;  %v1471_v61 = vsel %vm1440_vm8, %v1438_v17, %v1106_v45 }
 0x13f   : > { %v803_v56 = vpop.permute.xlu1 %802 }
 0x140   : > { %v3099_v47 = vpop.permute.xlu0 %668 }
 0x141   : > { %1095 = vrot.lane.b32.xlu1 %v3911_v22, %s2019_s24  ;;  %v1257_v22 = vsel %vm1242_vm2, %v1986_v23, %v3936_v25 }
 0x142   : > { %961 = vrot.lane.b32.xlu0 %v1985_v49, %s2018_s23  ;;  %v1290_v21 = vsel %vm1275_vm3, %v1257_v22, %v2877_v59 }
 0x143   : > { %v1207_v33 = vpop.permute.xlu1 %1206  ;;  %v1323_v45 = vsel %vm1308_vm5, %v1290_v21, %v3047_v27  ;;  %v3937_v27 = vld [vmem:[#allocation71_spill] sm:$0xff] }
 0x144   : > { %v1504_v8 = vsel %vm1473_vm9, %v1471_v61, %v1207_v33  ;;  %v1074_v38 = vpop.permute.xlu0 %1073  ;;  %v1356_v28 = vsel %vm1341_vm4, %v1323_v45, %v773_v58  ;;  %v3938_v58 = vld [vmem:[#allocation12_spill] sm:$0xff]  ;;  %v3940_v33 = vld [vmem:[#allocation33_spill] sm:$0xff] }
 0x145   : > { %792 = vrot.lane.b32.xlu1 %v3935_v26, %s2016_s21  ;;  %1898 = vmatprep.subr.msk.mxu0 %vm1510_vm10, %v1504_v8  ;;  %v1389_v20 = vsel %vm1374_vm6, %v1356_v28, %v874_v54  ;;  %v3939_v54 = vld [vmem:[#allocation57_spill] sm:$0xff]  ;;  %v3941_v28 = vld [vmem:[#allocation40_spill] sm:$0xff] }
 0x146   : > { %658 = vrot.lane.b32.xlu0 %v3116_v0, %s2015_s20  ;;  %1937 = vmatprep.subr.msk.mxu1 %vm1510_vm10, %v1504_v8  ;;  %v1422_v42 = vsel %vm1407_vm7, %v1389_v20, %v972_v36  ;;  %v1272_v8 = vsel %vm1242_vm2, %v3902_v13, %v3940_v33 }
 0x147   : > { %v904_v46 = vpop.permute.xlu1 %903  ;;  %v1455_v59 = vsel %vm1440_vm8, %v1422_v42, %v1074_v38  ;;  %v1305_v38 = vsel %vm1275_vm3, %v1272_v8, %v2979_v16  ;;  %v3943_v8 = vld [vmem:[#allocation68_spill] sm:$0xff] }
 0x148   : > { %v771_v3 = vpop.permute.xlu0 %770  ;;  %v1338_v23 = vsel %vm1308_vm5, %v1305_v38, %v701_v52 }
 0x149   : > { %1196 = vrot.lane.b32.xlu1 %v3915_v55, %s2020_s25 }
 0x14a   : > { %1063 = vrot.lane.b32.xlu0 %v3916_v43, %s2019_s24 }
 0x14b   : > { %v872_v30 = vpop.permute.xlu1 %871 }
 0x14c   : > { %v1175_v9 = vpop.permute.xlu0 %1174 }
 0x14d   : > { %v1488_v17 = vsel %vm1473_vm9, %v1455_v59, %v1175_v9  ;;  %893 = vrot.lane.b32.xlu1 %v3937_v27, %s2017_s22 }
 0x14e   : > { %760 = vrot.lane.b32.xlu0 %v3938_v58, %s2016_s21  ;;  %1899 = vmatpush3.xpose.msk.msra.mxu0 %vm1510_vm10, %v1488_v17 }
 0x14f   : > { %1953 = vmatpush3.xpose.msk.msra.mxu1 %vm1510_vm10, %v1488_v17  ;;  %v699_v55 = vpop.permute.xlu1 %698 }
 0x150   : > { %v1002_v43 = vpop.permute.xlu0 %1001 }
 0x151   : > { %861 = vrot.lane.b32.xlu1 %v3939_v54, %s2017_s22 }
 0x152   : > { %1164 = vrot.lane.b32.xlu0 %v3919_v62, %s2020_s25  ;;  %v1371_v62 = vsel %vm1341_vm4, %v1338_v23, %v803_v56  ;;  %v3942_v56 = vld [vmem:[#allocation74_spill] sm:$0xff] }
 0x153   : > { %v1104_v36 = vpop.permute.xlu1 %1103  ;;  %v1404_v21 = vsel %vm1374_vm6, %v1371_v62, %v904_v46  ;;  %v1256_v46 = vsel %vm1242_vm2, %v1985_v49, %v3942_v56  ;;  %v3198_v23 = vld [vmem:[%s2055_s17 + $0x120] sm:$0xff]  ;;  %v1337_v62 = vsel %vm1308_vm5, %v2985_v19, %v699_v55  ;;  %v3946_v55 = vld [vmem:[#allocation41_spill] sm:$0xff] }
 0x154   : > { %v970_v61 = vpop.permute.xlu0 %969  ;;  %v1437_v13 = vsel %vm1407_vm7, %v1404_v21, %v1002_v43  ;;  %v1289_v20 = vsel %vm1275_vm3, %v1256_v46, %v2863_v4 }
 0x155   : > { %688 = vrot.lane.b32.xlu1 %v3905_v41, %s2015_s20  ;;  %v1988_v41 = vld [vmem:[%s2055_s17 + $0x90] sm:$0xff]  ;;  %v1470_v16 = vsel %vm1440_vm8, %v1437_v13, %v1104_v36  ;;  %v1322_v59 = vsel %vm1308_vm5, %v1289_v20, %v3099_v47 }
 0x156   : > { %991 = vrot.lane.b32.xlu0 %v3913_v6, %s2018_s23  ;;  %v1355_v17 = vsel %vm1341_vm4, %v1322_v59, %v771_v3  ;;  %v3944_v3 = vld [vmem:[#allocation8_spill] sm:$0xff] }
 0x157   : > { %v801_v25 = vpop.permute.xlu1 %800  ;;  %v1388_v49 = vsel %vm1374_vm6, %v1355_v17, %v872_v30  ;;  %v3945_v30 = vld [vmem:[#allocation54_spill] sm:$0xff] }
 0x158   : > { %v667_v22 = vpop.permute.xlu0 %666  ;;  %v1421_v43 = vsel %vm1407_vm7, %v1388_v49, %v970_v61  ;;  %v1370_v13 = vsel %vm1341_vm4, %v1337_v62, %v801_v25  ;;  %v3219_v25 = vld [vmem:[%s2055_s17 + $0x60] sm:$0xff] }
 0x159   : > { %1093 = vrot.lane.b32.xlu1 %v3924_v37, %s2019_s24  ;;  %v3169_v37 = vld [vmem:[%s2055_s17 + $0x68] sm:$0xff]  ;;  %v1321_v56 = vsel %vm1308_vm5, %v2869_v12, %v667_v22  ;;  %v3947_v22 = vld [vmem:[#allocation69_spill] sm:$0xff] }
 0x15a   : > { %959 = vrot.lane.b32.xlu0 %v1988_v41, %s2018_s23 }
 0x15b   : > { %v1205_v6 = vpop.permute.xlu1 %1204 }
 0x15c   : > { %v1503_v52 = vsel %vm1473_vm9, %v1470_v16, %v1205_v6  ;;  %v1072_v45 = vpop.permute.xlu0 %1071  ;;  %v1991_v6 = vld [vmem:[%s2055_s17 + $0x80] sm:$0xff] }
 0x15d   : > { %790 = vrot.lane.b32.xlu1 %v3941_v28, %s2016_s21  ;;  %1900 = vmatprep.subr.msk.mxu0 %vm1510_vm10, %v1503_v52  ;;  %v1454_v4 = vsel %vm1440_vm8, %v1421_v43, %v1072_v45 }
 0x15e   : > { %656 = vrot.lane.b32.xlu0 %v3169_v37, %s2015_s20  ;;  %1938 = vmatprep.subr.msk.mxu1 %vm1510_vm10, %v1503_v52 }
 0x15f   : > { %v902_v42 = vpop.permute.xlu1 %901 }
 0x160   : > { %v769_v9 = vpop.permute.xlu0 %768 }
 0x161   : > { %1194 = vrot.lane.b32.xlu1 %v3925_v11, %s2020_s25  ;;  %v1354_v20 = vsel %vm1341_vm4, %v1321_v56, %v769_v9 }
 0x162   : > { %1061 = vrot.lane.b32.xlu0 %v3926_v63, %s2019_s24 }
 0x163   : > { %v870_v36 = vpop.permute.xlu1 %869 }
 0x164   : > { %v1173_v33 = vpop.permute.xlu0 %1172 }
 0x165   : > { %v1487_v47 = vsel %vm1473_vm9, %v1454_v4, %v1173_v33  ;;  %891 = vrot.lane.b32.xlu1 %v3943_v8, %s2017_s22 }
 0x166   : > { %758 = vrot.lane.b32.xlu0 %v3944_v3, %s2016_s21  ;;  %1901 = vmatpush3.xpose.msk.msra.mxu0 %vm1510_vm10, %v1487_v47 }
 0x167   : > { %1954 = vmatpush3.xpose.msk.msra.mxu1 %vm1510_vm10, %v1487_v47  ;;  %v697_v63 = vpop.permute.xlu1 %696  ;;  %v3246_v47 = vld [vmem:[%s2055_s17 + $0x110] sm:$0xff] }
 0x168   : > { %v1000_v11 = vpop.permute.xlu0 %999 }
 0x169   : > { %859 = vrot.lane.b32.xlu1 %v3945_v30, %s2017_s22 }
 0x16a   : > { %1162 = vrot.lane.b32.xlu0 %v3927_v48, %s2020_s25  ;;  %v1403_v48 = vsel %vm1374_vm6, %v1370_v13, %v902_v42  ;;  %v1387_v42 = vsel %vm1374_vm6, %v1354_v20, %v870_v36  ;;  %v3949_v36 = vld [vmem:[#allocation55_spill] sm:$0xff] }
 0x16b   : > { %v1102_v61 = vpop.permute.xlu1 %1101  ;;  %v1436_v16 = vsel %vm1407_vm7, %v1403_v48, %v1000_v11  ;;  %v1994_v11 = vld [vmem:[%s2055_s17 + $0x138] sm:$0xff] }
 0x16c   : > { %v968_v38 = vpop.permute.xlu0 %967 }
 0x16d   : > { %686 = vrot.lane.b32.xlu1 %v3198_v23, %s2015_s20  ;;  %v1420_v59 = vsel %vm1407_vm7, %v1387_v42, %v968_v38  ;;  %v1995_v42 = vld [vmem:[%s2055_s17 + $0x128] sm:$0xff] }
 0x16e   : > { %989 = vrot.lane.b32.xlu0 %v3909_v34, %s2018_s23  ;;  %v1469_v34 = vsel %vm1440_vm8, %v1436_v16, %v1102_v61  ;;  %v1336_v61 = vsel %vm1308_vm5, %v2970_v57, %v697_v63  ;;  %v3950_v63 = vld [vmem:[#allocation32_spill] sm:$0xff] }
 0x16f   : > { %v799_v21 = vpop.permute.xlu1 %798 }
 0x170   : > { %v665_v41 = vpop.permute.xlu0 %664  ;;  %v1369_v62 = vsel %vm1341_vm4, %v1336_v61, %v799_v21 }
 0x171   : > { %1091 = vrot.lane.b32.xlu1 %v3929_v44, %s2019_s24 }
 0x172   : > { %957 = vrot.lane.b32.xlu0 %v1991_v6, %s2018_s23 }
 0x173   : > { %v1203_v52 = vpop.permute.xlu1 %1202 }
 0x174   : > { %v1502_v45 = vsel %vm1473_vm9, %v1469_v34, %v1203_v52  ;;  %v1070_v19 = vpop.permute.xlu0 %1069 }
 0x175   : > { %788 = vrot.lane.b32.xlu1 %v3946_v55, %s2016_s21  ;;  %1902 = vmatprep.subr.msk.mxu0 %vm1510_vm10, %v1502_v45  ;;  %v1453_v49 = vsel %vm1440_vm8, %v1420_v59, %v1070_v19  ;;  %v3953_v59 = vld [vmem:[#allocation52_spill] sm:$0xff] }
 0x176   : > { %654 = vrot.lane.b32.xlu0 %v3219_v25, %s2015_s20  ;;  %1939 = vmatprep.subr.msk.mxu1 %vm1510_vm10, %v1502_v45  ;;  %v3951_v45 = vld [vmem:[#allocation6_spill] sm:$0xff] }
 0x177   : > { %v900_v44 = vpop.permute.xlu1 %899 }
 0x178   : > { %v767_v46 = vpop.permute.xlu0 %766  ;;  %v1402_v48 = vsel %vm1374_vm6, %v1369_v62, %v900_v44 }
 0x179   : > { %1192 = vrot.lane.b32.xlu1 %v3931_v15, %s2020_s25  ;;  %v3948_v15 = vld [vmem:[#allocation9_spill] sm:$0xff] }
 0x17a   : > { %1059 = vrot.lane.b32.xlu0 %v3932_v40, %s2019_s24 }
 0x17b   : > { %v868_v17 = vpop.permute.xlu1 %867 }
 0x17c   : > { %v1171_v43 = vpop.permute.xlu0 %1170 }
 0x17d   : > { %v1486_v12 = vsel %vm1473_vm9, %v1453_v49, %v1171_v43  ;;  %889 = vrot.lane.b32.xlu1 %v3947_v22, %s2017_s22 }
 0x17e   : > { %756 = vrot.lane.b32.xlu0 %v3948_v15, %s2016_s21  ;;  %1903 = vmatpush3.xpose.msk.msra.mxu0 %vm1510_vm10, %v1486_v12 }
 0x17f   : > { %1955 = vmatpush3.xpose.msk.msra.mxu1 %vm1510_vm10, %v1486_v12  ;;  %v695_v40 = vpop.permute.xlu1 %694 }
 0x180   : > { %v998_v9 = vpop.permute.xlu0 %997  ;;  %v1335_v43 = vsel %vm1308_vm5, %v2973_v60, %v695_v40 }
 0x181   : > { %857 = vrot.lane.b32.xlu1 %v3949_v36, %s2017_s22 }
 0x182   : > { %1160 = vrot.lane.b32.xlu0 %v3933_v29, %s2020_s25  ;;  %v1435_v29 = vsel %vm1407_vm7, %v1402_v48, %v998_v9 }
 0x183   : > { %v1100_v4 = vpop.permute.xlu1 %1099 }
 0x184   : > { %v966_v33 = vpop.permute.xlu0 %965  ;;  %v1468_v16 = vsel %vm1440_vm8, %v1435_v29, %v1100_v4 }
 0x185   : > { %684 = vrot.lane.b32.xlu1 %v3246_v47, %s2015_s20 }
 0x186   : > { %987 = vrot.lane.b32.xlu0 %v1994_v11, %s2018_s23  ;;  %v3954_v11 = vld [vmem:[#allocation35_spill] sm:$0xff] }
 0x187   : > { %v797_v38 = vpop.permute.xlu1 %796 }
 0x188   : > { %v663_v13 = vpop.permute.xlu0 %662  ;;  %v1368_v9 = vsel %vm1341_vm4, %v1335_v43, %v797_v38 }
 0x189   : > { %1089 = vrot.lane.b32.xlu1 %v3935_v26, %s2019_s24 }
 0x18a   : > { %955 = vrot.lane.b32.xlu0 %v3116_v0, %s2018_s23  ;;  %v1320_v0 = vsel %vm1308_vm5, %v2854_v53, %v665_v41  ;;  %v3952_v41 = vld [vmem:[#allocation66_spill] sm:$0xff] }
 0x18b   : > { %v1201_v6 = vpop.permute.xlu1 %1200  ;;  %v1353_v52 = vsel %vm1341_vm4, %v1320_v0, %v767_v46 }
 0x18c   : > { %v1501_v34 = vsel %vm1473_vm9, %v1468_v16, %v1201_v6  ;;  %v1068_v57 = vpop.permute.xlu0 %1067  ;;  %v3955_v16 = vld [vmem:[#allocation67_spill] sm:$0xff] }
 0x18d   : > { %1057 = vrot.lane.b32.xlu1 %v3938_v58, %s2019_s24  ;;  %1904 = vmatprep.subr.msk.mxu0 %vm1510_vm10, %v1501_v34  ;;  %v1386_v58 = vsel %vm1374_vm6, %v1353_v52, %v868_v17  ;;  %v3956_v6 = vld [vmem:[#allocation7_spill] sm:$0xff]  ;;  %v3332_v52 = vld [vmem:[%s2055_s17 + $0xf8] sm:$0xff] }
 0x18e   : > { %786 = vrot.lane.b32.xlu0 %v3950_v63, %s2016_s21  ;;  %1940 = vmatprep.subr.msk.mxu1 %vm1510_vm10, %v1501_v34  ;;  %v1419_v19 = vsel %vm1407_vm7, %v1386_v58, %v966_v33 }
 0x18f   : > { %v898_v26 = vpop.permute.xlu1 %897  ;;  %v1452_v56 = vsel %vm1440_vm8, %v1419_v19, %v1068_v57 }
 0x190   : > { %v765_v21 = vpop.permute.xlu0 %764  ;;  %v1401_v33 = vsel %vm1374_vm6, %v1368_v9, %v898_v26  ;;  %v3960_v9 = vld [vmem:[#allocation64_spill] sm:$0xff] }
 0x191   : > { %754 = vrot.lane.b32.xlu1 %v3951_v45, %s2016_s21 }
 0x192   : > { %1190 = vrot.lane.b32.xlu0 %v3937_v27, %s2020_s25 }
 0x193   : > { %v866_v44 = vpop.permute.xlu1 %865 }
 0x194   : > { %v1169_v20 = vpop.permute.xlu0 %1168 }
 0x195   : > { %v1485_v53 = vsel %vm1473_vm9, %v1452_v56, %v1169_v20  ;;  %1158 = vrot.lane.b32.xlu1 %v3939_v54, %s2020_s25  ;;  %v3293_v54 = vld [vmem:[%s2055_s17 + $0x108] sm:$0xff] }
 0x196   : > { %887 = vrot.lane.b32.xlu0 %v3952_v41, %s2017_s22  ;;  %1905 = vmatpush3.xpose.msk.msra.mxu0 %vm1510_vm10, %v1485_v53 }
 0x197   : > { %1956 = vmatpush3.xpose.msk.msra.mxu1 %vm1510_vm10, %v1485_v53  ;;  %v693_v27 = vpop.permute.xlu1 %692 }
 0x198   : > { %v996_v46 = vpop.permute.xlu0 %995 }
 0x199   : > { %985 = vrot.lane.b32.xlu1 %v1995_v42, %s2018_s23  ;;  %v1434_v61 = vsel %vm1407_vm7, %v1401_v33, %v996_v46  ;;  %v3958_v46 = vld [vmem:[#allocation25_spill] sm:$0xff] }
 0x19a   : > { %855 = vrot.lane.b32.xlu0 %v3953_v59, %s2017_s22 }
 0x19b   : > { %v1098_v17 = vpop.permute.xlu1 %1097 }
 0x19c   : > { %v964_v49 = vpop.permute.xlu0 %963 }
 0x19d   : > { %953 = vrot.lane.b32.xlu1 %v3169_v37, %s2018_s23  ;;  %v1467_v37 = vsel %vm1440_vm8, %v1434_v61, %v1098_v17 }
 0x19e   : > { %682 = vrot.lane.b32.xlu0 %v3293_v54, %s2015_s20 }
 0x19f   : > { %v795_v12 = vpop.permute.xlu1 %794 }
 0x1a0   : > { %v661_v4 = vpop.permute.xlu0 %660 }
 0x1a1   : > { %784 = vrot.lane.b32.xlu1 %v3954_v11, %s2016_s21  ;;  %v1318_v17 = vsel %vm1308_vm5, %v2838_v39, %v661_v4  ;;  %v3961_v4 = vld [vmem:[#allocation50_spill] sm:$0xff] }
 0x1a2   : > { %1087 = vrot.lane.b32.xlu0 %v3941_v28, %s2019_s24  ;;  %v1319_v28 = vsel %vm1308_vm5, %v2857_v1, %v663_v13  ;;  %v3957_v13 = vld [vmem:[#allocation53_spill] sm:$0xff] }
 0x1a3   : > { %v1199_v62 = vpop.permute.xlu1 %1198  ;;  %v1352_v29 = vsel %vm1341_vm4, %v1319_v28, %v765_v21 }
 0x1a4   : > { %v1500_v48 = vsel %vm1473_vm9, %v1467_v37, %v1199_v62  ;;  %v1066_v60 = vpop.permute.xlu0 %1065 }
 0x1a5   : > { %1188 = vrot.lane.b32.xlu1 %v3943_v8, %s2020_s25  ;;  %1906 = vmatprep.subr.msk.mxu0 %vm1510_vm10, %v1500_v48  ;;  %v1385_v8 = vsel %vm1374_vm6, %v1352_v29, %v866_v44 }
 0x1a6   : > { %1055 = vrot.lane.b32.xlu0 %v3944_v3, %s2019_s24  ;;  %1941 = vmatprep.subr.msk.mxu1 %vm1510_vm10, %v1500_v48  ;;  %v1418_v3 = vsel %vm1407_vm7, %v1385_v8, %v964_v49  ;;  %v1998_v48 = vld [vmem:[%s2055_s17 + $0x50] sm:$0xff] }
 0x1a7   : > { %v896_v40 = vpop.permute.xlu1 %895  ;;  %v1451_v57 = vsel %vm1440_vm8, %v1418_v3, %v1066_v60  ;;  %v3379_v60 = vld [vmem:[%s2055_s17 + $0xf0] sm:$0xff] }
 0x1a8   : > { %v763_v38 = vpop.permute.xlu0 %762 }
 0x1a9   : > { %885 = vrot.lane.b32.xlu1 %v3955_v16, %s2017_s22  ;;  %v1351_v43 = vsel %vm1341_vm4, %v1318_v17, %v763_v38  ;;  %v3966_v17 = vld [vmem:[#allocation20_spill] sm:$0xff] }
 0x1aa   : > { %752 = vrot.lane.b32.xlu0 %v3956_v6, %s2016_s21 }
 0x1ab   : > { %v864_v34 = vpop.permute.xlu1 %863 }
 0x1ac   : > { %v1167_v26 = vpop.permute.xlu0 %1166 }
 0x1ad   : > { %v1484_v1 = vsel %vm1473_vm9, %v1451_v57, %v1167_v26  ;;  %853 = vrot.lane.b32.xlu1 %v3957_v13, %s2017_s22 }
 0x1ae   : > { %1156 = vrot.lane.b32.xlu0 %v3945_v30, %s2020_s25  ;;  %1907 = vmatpush3.xpose.msk.msra.mxu0 %vm1510_vm10, %v1484_v1  ;;  %v1334_v30 = vsel %vm1308_vm5, %v2954_v24, %v693_v27  ;;  %v3959_v27 = vld [vmem:[#allocation4_spill] sm:$0xff] }
 0x1af   : > { %1957 = vmatpush3.xpose.msk.msra.mxu1 %vm1510_vm10, %v1484_v1  ;;  %v691_v0 = vpop.permute.xlu1 %690  ;;  %v1367_v56 = vsel %vm1341_vm4, %v1334_v30, %v795_v12  ;;  %v1384_v12 = vsel %vm1374_vm6, %v1351_v43, %v864_v34  ;;  %v3965_v30 = vld [vmem:[#allocation51_spill] sm:$0xff] }
 0x1b0   : > { %v994_v21 = vpop.permute.xlu0 %993  ;;  %v1400_v53 = vsel %vm1374_vm6, %v1367_v56, %v896_v40  ;;  %v1333_v38 = vsel %vm1308_vm5, %v2957_v32, %v691_v0  ;;  %v3963_v0 = vld [vmem:[#allocation65_spill] sm:$0xff] }
 0x1b1   : > { %680 = vrot.lane.b32.xlu1 %v3332_v52, %s2015_s20 }
 0x1b2   : > { %983 = vrot.lane.b32.xlu0 %v3198_v23, %s2018_s23  ;;  %v1433_v23 = vsel %vm1407_vm7, %v1400_v53, %v994_v21  ;;  %v3964_v21 = vld [vmem:[#allocation5_spill] sm:$0xff] }
 0x1b3   : > { %v1096_v58 = vpop.permute.xlu1 %1095 }
 0x1b4   : > { %v962_v19 = vpop.permute.xlu0 %961 }
 0x1b5   : > { %1085 = vrot.lane.b32.xlu1 %v3946_v55, %s2019_s24  ;;  %v1466_v55 = vsel %vm1440_vm8, %v1433_v23, %v1096_v58 }
 0x1b6   : > { %951 = vrot.lane.b32.xlu0 %v3219_v25, %s2018_s23 }
 0x1b7   : > { %v793_v44 = vpop.permute.xlu1 %792 }
 0x1b8   : > { %v659_v20 = vpop.permute.xlu0 %658  ;;  %v1366_v8 = vsel %vm1341_vm4, %v1333_v38, %v793_v44 }
 0x1b9   : > { %1053 = vrot.lane.b32.xlu1 %v3948_v15, %s2019_s24 }
 0x1ba   : > { %782 = vrot.lane.b32.xlu0 %v3958_v46, %s2016_s21 }
 0x1bb   : > { %v1197_v25 = vpop.permute.xlu1 %1196 }
 0x1bc   : > { %v1499_v42 = vsel %vm1473_vm9, %v1466_v55, %v1197_v25  ;;  %v1064_v24 = vpop.permute.xlu0 %1063 }
 0x1bd   : > { %750 = vrot.lane.b32.xlu1 %v3959_v27, %s2016_s21  ;;  %1908 = vmatprep.subr.msk.mxu0 %vm1510_vm10, %v1499_v42 }
 0x1be   : > { %1186 = vrot.lane.b32.xlu0 %v3947_v22, %s2020_s25  ;;  %1942 = vmatprep.subr.msk.mxu1 %vm1510_vm10, %v1499_v42  ;;  %v1417_v22 = vsel %vm1407_vm7, %v1384_v12, %v962_v19  ;;  %v2001_v42 = vld [vmem:[%s2055_s17 + $0x48] sm:$0xff] }
 0x1bf   : > { %v894_v15 = vpop.permute.xlu1 %893  ;;  %v1450_v61 = vsel %vm1440_vm8, %v1417_v22, %v1064_v24  ;;  %v3967_v22 = vld [vmem:[#allocation3_spill] sm:$0xff] }
 0x1c0   : > { %v761_v49 = vpop.permute.xlu0 %760  ;;  %v1399_v34 = vsel %vm1374_vm6, %v1366_v8, %v894_v15 }
 0x1c1   : > { %1154 = vrot.lane.b32.xlu1 %v3949_v36, %s2020_s25 }
 0x1c2   : > { %883 = vrot.lane.b32.xlu0 %v3960_v9, %s2017_s22 }
 0x1c3   : > { %v862_v33 = vpop.permute.xlu1 %861 }
 0x1c4   : > { %v1165_v37 = vpop.permute.xlu0 %1164 }
 0x1c5   : > { %v1483_v39 = vsel %vm1473_vm9, %v1450_v61, %v1165_v37  ;;  %981 = vrot.lane.b32.xlu1 %v3246_v47, %s2018_s23  ;;  %v3962_v47 = vld [vmem:[#allocation27_spill] sm:$0xff] }
 0x1c6   : > { %851 = vrot.lane.b32.xlu0 %v3961_v4, %s2017_s22  ;;  %1909 = vmatpush3.xpose.msk.msra.mxu0 %vm1510_vm10, %v1483_v39 }
 0x1c7   : > { %1958 = vmatpush3.xpose.msk.msra.mxu1 %vm1510_vm10, %v1483_v39  ;;  %v689_v36 = vpop.permute.xlu1 %688  ;;  %v3968_v39 = vld [vmem:[#allocation63_spill] sm:$0xff] }
 0x1c8   : > { %v992_v62 = vpop.permute.xlu0 %991 }
 0x1c9   : > { %949 = vrot.lane.b32.xlu1 %v1998_v48, %s2018_s23  ;;  %v1432_v57 = vsel %vm1407_vm7, %v1399_v34, %v992_v62 }
 0x1ca   : > { %678 = vrot.lane.b32.xlu0 %v3379_v60, %s2015_s20 }
 0x1cb   : > { %v1094_v40 = vpop.permute.xlu1 %1093 }
 0x1cc   : > { %v960_v28 = vpop.permute.xlu0 %959  ;;  %v1465_v26 = vsel %vm1440_vm8, %v1432_v57, %v1094_v40  ;;  %v3969_v40 = vld [vmem:[#allocation48_spill] sm:$0xff] }
 0x1cd   : > { %780 = vrot.lane.b32.xlu1 %v3962_v47, %s2016_s21 }
 0x1ce   : > { %1083 = vrot.lane.b32.xlu0 %v3950_v63, %s2019_s24 }
 0x1cf   : > { %v791_v29 = vpop.permute.xlu1 %790 }
 0x1d0   : > { %v657_v3 = vpop.permute.xlu0 %656 }
 0x1d1   : > { %1184 = vrot.lane.b32.xlu1 %v3952_v41, %s2020_s25 }
 0x1d2   : > { %1051 = vrot.lane.b32.xlu0 %v3951_v45, %s2019_s24  ;;  %v1317_v45 = vsel %vm1308_vm5, %v2841_v2, %v659_v20  ;;  %v2000_v20 = vld [vmem:[%s2055_s17 + $0xe0] sm:$0xff] }
 0x1d3   : > { %v1195_v63 = vpop.permute.xlu1 %1194  ;;  %v1350_v19 = vsel %vm1341_vm4, %v1317_v45, %v761_v49 }
 0x1d4   : > { %v1498_v1 = vsel %vm1473_vm9, %v1465_v26, %v1195_v63  ;;  %v1062_v32 = vpop.permute.xlu0 %1061  ;;  %v1383_v44 = vsel %vm1374_vm6, %v1350_v19, %v862_v33 }
 0x1d5   : > { %881 = vrot.lane.b32.xlu1 %v3963_v0, %s2017_s22  ;;  %1910 = vmatprep.subr.msk.mxu0 %vm1510_vm10, %v1498_v1  ;;  %v1416_v56 = vsel %vm1407_vm7, %v1383_v44, %v960_v28 }
 0x1d6   : > { %748 = vrot.lane.b32.xlu0 %v3964_v21, %s2016_s21  ;;  %1943 = vmatprep.subr.msk.mxu1 %vm1510_vm10, %v1498_v1  ;;  %v1449_v23 = vsel %vm1440_vm8, %v1416_v56, %v1062_v32 }
 0x1d7   : > { %v892_v41 = vpop.permute.xlu1 %891 }
 0x1d8   : > { %v759_v58 = vpop.permute.xlu0 %758 }
 0x1d9   : > { %849 = vrot.lane.b32.xlu1 %v3965_v30, %s2017_s22 }
 0x1da   : > { %1152 = vrot.lane.b32.xlu0 %v3953_v59, %s2020_s25 }
 0x1db   : > { %v860_v53 = vpop.permute.xlu1 %859 }
 0x1dc   : > { %v1163_v55 = vpop.permute.xlu0 %1162 }
 0x1dd   : > { %v1482_v2 = vsel %vm1473_vm9, %v1449_v23, %v1163_v55  ;;  %676 = vrot.lane.b32.xlu1 %v2000_v20, %s2015_s20 }
 0x1de   : > { %979 = vrot.lane.b32.xlu0 %v3293_v54, %s2018_s23  ;;  %1911 = vmatpush3.xpose.msk.msra.mxu0 %vm1510_vm10, %v1482_v2  ;;  %v1332_v54 = vsel %vm1308_vm5, %v2938_v51, %v689_v36 }
 0x1df   : > { %1959 = vmatpush3.xpose.msk.msra.mxu1 %vm1510_vm10, %v1482_v2  ;;  %v687_v25 = vpop.permute.xlu1 %686  ;;  %v1365_v43 = vsel %vm1341_vm4, %v1332_v54, %v791_v29  ;;  %v3497_v2 = vld [vmem:[%s3663_s1] sm:$0xff] }
 0x1e0   : > { %v990_v59 = vpop.permute.xlu0 %989  ;;  %v1331_v32 = vsel %vm1308_vm5, %v2941_v35, %v687_v25  ;;  %1928 = vmatprep.mubr.msk.f32.mxu0 %vm1510_vm10, %v3497_v2 }
 0x1e1   : > { %1081 = vrot.lane.b32.xlu1 %v3954_v11, %s2019_s24  ;;  %v1398_v11 = vsel %vm1374_vm6, %v1365_v43, %v892_v41 }
 0x1e2   : > { %947 = vrot.lane.b32.xlu0 %v2001_v42, %s2018_s23  ;;  %v1431_v33 = vsel %vm1407_vm7, %v1398_v11, %v990_v59  ;;  %v2004_v59 = vld [vmem:[%s2055_s17 + $0x30] sm:$0xff] }
 0x1e3   : > { %v1092_v24 = vpop.permute.xlu1 %1091 }
 0x1e4   : > { %v958_v15 = vpop.permute.xlu0 %957 }
 0x1e5   : > { %1049 = vrot.lane.b32.xlu1 %v3956_v6, %s2019_s24  ;;  %v1464_v6 = vsel %vm1440_vm8, %v1431_v33, %v1092_v24 }
 0x1e6   : > { %778 = vrot.lane.b32.xlu0 %v3966_v17, %s2016_s21 }
 0x1e7   : > { %v789_v49 = vpop.permute.xlu1 %788 }
 0x1e8   : > { %v655_v12 = vpop.permute.xlu0 %654  ;;  %v1364_v45 = vsel %vm1341_vm4, %v1331_v32, %v789_v49 }
 0x1e9   : > { %746 = vrot.lane.b32.xlu1 %v3967_v22, %s2016_s21 }
 0x1ea   : > { %1182 = vrot.lane.b32.xlu0 %v3955_v16, %s2020_s25  ;;  %v1316_v16 = vsel %vm1308_vm5, %v2822_v31, %v657_v3  ;;  %v2002_v31 = vld [vmem:[%s2055_s17 + $0x38] sm:$0xff] }
 0x1eb   : > { %v1193_v61 = vpop.permute.xlu1 %1192  ;;  %v1349_v48 = vsel %vm1341_vm4, %v1316_v16, %v759_v58  ;;  %v2003_v3 = vld [vmem:[%s2055_s17 + $0xd8] sm:$0xff] }
 0x1ec   : > { %v1497_v37 = vsel %vm1473_vm9, %v1464_v6, %v1193_v61  ;;  %v1060_v51 = vpop.permute.xlu0 %1059 }
 0x1ed   : > { %1150 = vrot.lane.b32.xlu1 %v3957_v13, %s2020_s25  ;;  %1912 = vmatprep.subr.msk.mxu0 %vm1510_vm10, %v1497_v37  ;;  %v1382_v13 = vsel %vm1374_vm6, %v1349_v48, %v860_v53  ;;  %v3971_v53 = vld [vmem:[#allocation49_spill] sm:$0xff] }
 0x1ee   : > { %879 = vrot.lane.b32.xlu0 %v3968_v39, %s2017_s22  ;;  %1944 = vmatprep.subr.msk.mxu1 %vm1510_vm10, %v1497_v37  ;;  %v1415_v28 = vsel %vm1407_vm7, %v1382_v13, %v958_v15 }
 0x1ef   : > { %v890_v36 = vpop.permute.xlu1 %889  ;;  %v1448_v29 = vsel %vm1440_vm8, %v1415_v28, %v1060_v51 }
 0x1f0   : > { %v757_v62 = vpop.permute.xlu0 %756 }
 0x1f1   : > { %977 = vrot.lane.b32.xlu1 %v3332_v52, %s2018_s23 }
 0x1f2   : > { %847 = vrot.lane.b32.xlu0 %v3969_v40, %s2017_s22  ;;  %v3972_v40 = vld [vmem:[#allocation16_spill] sm:$0xff] }
 0x1f3   : > { %v858_v38 = vpop.permute.xlu1 %857 }
 0x1f4   : > { %v1161_v8 = vpop.permute.xlu0 %1160 }
 0x1f5   : > { %v1481_v34 = vsel %vm1473_vm9, %v1448_v29, %v1161_v8  ;;  %945 = vrot.lane.b32.xlu1 %v2002_v31, %s2018_s23  ;;  %v3974_v31 = vld [vmem:[#allocation81_spill] sm:$0xff] }
 0x1f6   : > { %674 = vrot.lane.b32.xlu0 %v2003_v3, %s2015_s20  ;;  %1913 = vmatpush3.xpose.msk.msra.mxu0 %vm1510_vm10, %v1481_v34 }
 0x1f7   : > { %1960 = vmatpush3.xpose.msk.msra.mxu1 %vm1510_vm10, %v1481_v34  ;;  %v685_v52 = vpop.permute.xlu1 %684  ;;  %v3973_v34 = vld [vmem:[#allocation21_spill] sm:$0xff] }
 0x1f8   : > { %v988_v57 = vpop.permute.xlu0 %987  ;;  %v1330_v17 = vsel %vm1308_vm5, %v2922_v10, %v685_v52  ;;  %v1314_v10 = vsel %vm1308_vm5, %v2806_v7, %v3013_v50  ;;  %v1313_v3 = vsel %vm1308_vm5, %v3974_v31, %v3973_v34 }
 0x1f9   : > { %776 = vrot.lane.b32.xlu1 %v3887_v14, %s2016_s21  ;;  %v1397_v14 = vsel %vm1374_vm6, %v1364_v45, %v890_v36 }
 0x1fa   : > { %1079 = vrot.lane.b32.xlu0 %v3958_v46, %s2019_s24  ;;  %v3970_v46 = vld [vmem:[#allocation2_spill] sm:$0xff] }
 0x1fb   : > { %v1090_v26 = vpop.permute.xlu1 %1089 }
 0x1fc   : > { %v956_v63 = vpop.permute.xlu0 %955 }
 0x1fd   : > { %1180 = vrot.lane.b32.xlu1 %v3960_v9, %s2020_s25  ;;  %v1315_v9 = vsel %vm1308_vm5, %v2825_v5, %v655_v12 }
 0x1fe   : > { %1047 = vrot.lane.b32.xlu0 %v3959_v27, %s2019_s24  ;;  %v1430_v27 = vsel %vm1407_vm7, %v1397_v14, %v988_v57  ;;  %v1348_v19 = vsel %vm1341_vm4, %v1315_v9, %v757_v62 }
 0x1ff   : > { %v1058_v1 = vpop.permute.xlu1 %1057  ;;  %v1463_v35 = vsel %vm1440_vm8, %v1430_v27, %v1090_v26  ;;  %v1381_v56 = vsel %vm1374_vm6, %v1348_v19, %v858_v38 }
 0x200   : > { %v787_v41 = vpop.permute.xlu0 %786  ;;  %v1414_v23 = vsel %vm1407_vm7, %v1381_v56, %v956_v63  ;;  %v3975_v56 = vld [vmem:[#allocation82_spill] sm:$0xff] }
 0x201   : > { %877 = vrot.lane.b32.xlu1 %v2569_v18, %s2017_s22  ;;  %v1447_v5 = vsel %vm1440_vm8, %v1414_v23, %v1058_v1  ;;  %v1363_v49 = vsel %vm1341_vm4, %v1330_v17, %v787_v41  ;;  %v3977_v17 = vld [vmem:[#allocation79_spill] sm:$0xff] }
 0x202   : > { %744 = vrot.lane.b32.xlu0 %v3970_v46, %s2016_s21 }
 0x203   : > { %v755_v58 = vpop.permute.xlu1 %754 }
 0x204   : > { %v1191_v44 = vpop.permute.xlu0 %1190  ;;  %v1347_v6 = vsel %vm1341_vm4, %v1314_v10, %v755_v58 }
 0x205   : > { %v1496_v18 = vsel %vm1473_vm9, %v1463_v35, %v1191_v44  ;;  %845 = vrot.lane.b32.xlu1 %v3971_v53, %s2017_s22 }
 0x206   : > { %1148 = vrot.lane.b32.xlu0 %v3961_v4, %s2020_s25  ;;  %1914 = vmatprep.subr.msk.mxu0 %vm1510_vm10, %v1496_v18  ;;  %v3511_v4 = vld [vmem:[%s3663_s1 + $0x10] sm:$0xff] }
 0x207   : > { %1945 = vmatprep.subr.msk.mxu1 %vm1510_vm10, %v1496_v18  ;;  %v1159_v55 = vpop.permute.xlu1 %1158  ;;  %1932 = vmatprep.mubr.msk.f32.mxu1 %vm1510_vm10, %v3511_v4 }
 0x208   : > { %v1480_v20 = vsel %vm1473_vm9, %v1447_v5, %v1159_v55  ;;  %v888_v25 = vpop.permute.xlu0 %887 }
 0x209   : > { %943 = vrot.lane.b32.xlu1 %v2004_v59, %s2018_s23  ;;  %1915 = vmatpush3.xpose.msk.msra.mxu0 %vm1510_vm10, %v1480_v20 }
 0x20a   : > { %975 = vrot.lane.b32.xlu0 %v3379_v60, %s2018_s23  ;;  %1961 = vmatpush3.xpose.msk.msra.mxu1 %vm1510_vm10, %v1480_v20 }
 0x20b   : > { %v986_v42 = vpop.permute.xlu1 %985 }
 0x20c   : > { %v856_v24 = vpop.permute.xlu0 %855 }
 0x20d   : > { %1045 = vrot.lane.b32.xlu1 %v3964_v21, %s2019_s24  ;;  %v1396_v21 = vsel %vm1374_vm6, %v1363_v49, %v888_v25  ;;  %v1380_v61 = vsel %vm1374_vm6, %v1347_v6, %v856_v24 }
 0x20e   : > { %1077 = vrot.lane.b32.xlu0 %v3962_v47, %s2019_s24  ;;  %v1429_v12 = vsel %vm1407_vm7, %v1396_v21, %v986_v42 }
 0x20f   : > { %v954_v15 = vpop.permute.xlu1 %953 }
 0x210   : > { %v683_v60 = vpop.permute.xlu0 %682  ;;  %v1413_v37 = vsel %vm1407_vm7, %v1380_v61, %v954_v15 }
 0x211   : > { %1146 = vrot.lane.b32.xlu1 %v3965_v30, %s2020_s25  ;;  %v1329_v28 = vsel %vm1308_vm5, %v3972_v40, %v683_v60  ;;  %v3976_v60 = vld [vmem:[#allocation61_spill] sm:$0xff] }
 0x212   : > { %1178 = vrot.lane.b32.xlu0 %v3963_v0, %s2020_s25 }
 0x213   : > { %v785_v54 = vpop.permute.xlu1 %784 }
 0x214   : > { %v1088_v43 = vpop.permute.xlu0 %1087  ;;  %v1362_v29 = vsel %vm1341_vm4, %v1329_v28, %v785_v54  ;;  %v1312_v54 = vsel %vm1308_vm5, %v3977_v17, %v3976_v60 }
 0x215   : > { %v1462_v47 = vsel %vm1440_vm8, %v1429_v12, %v1088_v43 }
 0x217   : > { %v1189_v11 = vpop.permute.xlu1 %1188 }
 0x218   : > { %v1495_v22 = vsel %vm1473_vm9, %v1462_v47, %v1189_v11  ;;  %v1056_v30 = vpop.permute.xlu0 %1055 }
 0x219   : > { %1916 = vmatprep.subr.msk.mxu0 %vm1510_vm10, %v1495_v22  ;;  %1946 = vmatprep.subr.msk.mxu1 %vm1510_vm10, %v1495_v22  ;;  %v1446_v39 = vsel %vm1440_vm8, %v1413_v37, %v1056_v30  ;;  %v3978_v37 = vld [vmem:[#allocation83_spill] sm:$0xff] }
 0x21b   : > { %v886_v0 = vpop.permute.xlu1 %885 }
 0x21c   : > { %v753_v33 = vpop.permute.xlu0 %752  ;;  %v1395_v8 = vsel %vm1374_vm6, %v1362_v29, %v886_v0 }
 0x21d   : > { %v1346_v26 = vsel %vm1341_vm4, %v1313_v3, %v753_v33 }
 0x21f   : > { %v854_v51 = vpop.permute.xlu1 %853 }
 0x220   : > { %v1157_v36 = vpop.permute.xlu0 %1156  ;;  %v1379_v32 = vsel %vm1374_vm6, %v1346_v26, %v854_v51 }
 0x221   : > { %v1479_v16 = vsel %vm1473_vm9, %v1446_v39, %v1157_v36 }
 0x222   : > { %1917 = vmatpush3.xpose.msk.msra.mxu0 %vm1510_vm10, %v1479_v16  ;;  %1962 = vmatpush3.xpose.msk.msra.mxu1 %vm1510_vm10, %v1479_v16 }
 0x223   : > { %v681_v62 = vpop.permute.xlu1 %680 }
 0x224   : > { %v984_v48 = vpop.permute.xlu0 %983  ;;  %v1328_v18 = vsel %vm1308_vm5, %v3975_v56, %v681_v62  ;;  %v3979_v62 = vld [vmem:[#allocation17_spill] sm:$0xff] }
 0x225   : > { %v1428_v52 = vsel %vm1407_vm7, %v1395_v8, %v984_v48  ;;  %v3980_v48 = vld [vmem:[#allocation80_spill] sm:$0xff] }
 0x227   : > { %v1086_v7 = vpop.permute.xlu1 %1085 }
 0x228   : > { %v952_v50 = vpop.permute.xlu0 %951  ;;  %v1461_v63 = vsel %vm1440_vm8, %v1428_v52, %v1086_v7  ;;  %v1311_v7 = vsel %vm1308_vm5, %v3980_v48, %v3979_v62  ;;  %v1507_v48 = vld [vmem:[%s3663_s1 + $0x8] sm:$0xff] }
 0x229   : > { %v1412_v45 = vsel %vm1407_vm7, %v1379_v32, %v952_v50 }
 0x22b   : > { %v1054_v13 = vpop.permute.xlu1 %1053 }
 0x22c   : > { %v783_v38 = vpop.permute.xlu0 %782  ;;  %v1445_v14 = vsel %vm1440_vm8, %v1412_v45, %v1054_v13 }
 0x22d   : > { %v1361_v23 = vsel %vm1341_vm4, %v1328_v18, %v783_v38 }
 0x22f   : > { %v751_v57 = vpop.permute.xlu1 %750 }
 0x230   : > { %v1187_v1 = vpop.permute.xlu0 %1186  ;;  %v1345_v43 = vsel %vm1341_vm4, %v1312_v54, %v751_v57 }
 0x231   : > { %v1494_v41 = vsel %vm1473_vm9, %v1461_v63, %v1187_v1 }
 0x232   : > { %1918 = vmatprep.subr.msk.mxu0 %vm1510_vm10, %v1494_v41  ;;  %1947 = vmatprep.subr.msk.mxu1 %vm1510_vm10, %v1494_v41  ;;  %v3981_v41 = vld [vmem:[#allocation22_spill] sm:$0xff] }
 0x233   : > { %v1155_v46 = vpop.permute.xlu1 %1154 }
 0x234   : > { %v1478_v9 = vsel %vm1473_vm9, %v1445_v14, %v1155_v46  ;;  %v884_v27 = vpop.permute.xlu0 %883 }
 0x235   : > { %1919 = vmatpush3.xpose.msk.msra.mxu0 %vm1510_vm10, %v1478_v9  ;;  %1963 = vmatpush3.xpose.msk.msra.mxu1 %vm1510_vm10, %v1478_v9  ;;  %v1394_v55 = vsel %vm1374_vm6, %v1361_v23, %v884_v27  ;;  %v3983_v23 = vld [vmem:[#allocation77_spill] sm:$0xff] }
 0x237   : > { %v982_v58 = vpop.permute.xlu1 %981 }
 0x238   : > { %v852_v19 = vpop.permute.xlu0 %851  ;;  %v1427_v20 = vsel %vm1407_vm7, %v1394_v55, %v982_v58 }
 0x239   : > { %v1378_v21 = vsel %vm1374_vm6, %v1345_v43, %v852_v19  ;;  %v3985_v43 = vld [vmem:[#allocation78_spill] sm:$0xff] }
 0x23b   : > { %v950_v35 = vpop.permute.xlu1 %949 }
 0x23c   : > { %v679_v44 = vpop.permute.xlu0 %678  ;;  %v1411_v12 = vsel %vm1407_vm7, %v1378_v21, %v950_v35 }
 0x23d   : > { %v1327_v51 = vsel %vm1308_vm5, %v3978_v37, %v679_v44 }
 0x23f   : > { %v781_v53 = vpop.permute.xlu1 %780 }
 0x240   : > { %v1084_v5 = vpop.permute.xlu0 %1083  ;;  %v1360_v36 = vsel %vm1341_vm4, %v1327_v51, %v781_v53  ;;  %v3982_v53 = vld [vmem:[#allocation19_spill] sm:$0xff] }
 0x241   : > { %v1460_v25 = vsel %vm1440_vm8, %v1427_v20, %v1084_v5  ;;  %v1310_v5 = vsel %vm1308_vm5, %v3983_v23, %v3982_v53 }
 0x243   : > { %v1185_v59 = vpop.permute.xlu1 %1184 }
 0x244   : > { %v1493_v42 = vsel %vm1473_vm9, %v1460_v25, %v1185_v59  ;;  %v1052_v24 = vpop.permute.xlu0 %1051 }
 0x245   : > { %1920 = vmatprep.subr.msk.mxu0 %vm1510_vm10, %v1493_v42  ;;  %1948 = vmatprep.subr.msk.mxu1 %vm1510_vm10, %v1493_v42  ;;  %v1444_v11 = vsel %vm1440_vm8, %v1411_v12, %v1052_v24 }
 0x247   : > { %v882_v15 = vpop.permute.xlu1 %881 }
 0x248   : > { %v749_v49 = vpop.permute.xlu0 %748  ;;  %v1393_v16 = vsel %vm1374_vm6, %v1360_v36, %v882_v15 }
 0x249   : > { %v1344_v40 = vsel %vm1341_vm4, %v1311_v7, %v749_v49  ;;  %v3984_v49 = vld [vmem:[#allocation60_spill] sm:$0xff]  ;;  %v1509_v7 = vld [vmem:[%s3663_s1 + $0x18] sm:$0xff] }
 0x24a   : > { %v1309_v21 = vsel %vm1308_vm5, %v3985_v43, %v3984_v49 }
 0x24b   : > { %v850_v47 = vpop.permute.xlu1 %849 }
 0x24c   : > { %v1153_v22 = vpop.permute.xlu0 %1152  ;;  %v1377_v29 = vsel %vm1374_vm6, %v1344_v40, %v850_v47  ;;  %v3986_v47 = vld [vmem:[#allocation15_spill] sm:$0xff] }
 0x24d   : > { %v1477_v30 = vsel %vm1473_vm9, %v1444_v11, %v1153_v22 }
 0x24e   : > { %1921 = vmatpush3.xpose.msk.msra.mxu0 %vm1510_vm10, %v1477_v30  ;;  %1964 = vmatpush3.xpose.msk.msra.mxu1 %vm1510_vm10, %v1477_v30 }
 0x24f   : > { %v677_v0 = vpop.permute.xlu1 %676 }
 0x250   : > { %v980_v10 = vpop.permute.xlu0 %979  ;;  %v1326_v45 = vsel %vm1308_vm5, %v3981_v41, %v677_v0 }
 0x251   : > { %v1426_v50 = vsel %vm1407_vm7, %v1393_v16, %v980_v10 }
 0x253   : > { %v1082_v33 = vpop.permute.xlu1 %1081 }
 0x254   : > { %v948_v6 = vpop.permute.xlu0 %947  ;;  %v1459_v28 = vsel %vm1440_vm8, %v1426_v50, %v1082_v33 }
 0x255   : > { %v1410_v34 = vsel %vm1407_vm7, %v1377_v29, %v948_v6 }
 0x257   : > { %v1050_v61 = vpop.permute.xlu1 %1049 }
 0x258   : > { %v779_v39 = vpop.permute.xlu0 %778  ;;  %v1443_v31 = vsel %vm1440_vm8, %v1410_v34, %v1050_v61 }
 0x259   : > { %v1359_v46 = vsel %vm1341_vm4, %v1326_v45, %v779_v39 }
 0x25b   : > { %v747_v13 = vpop.permute.xlu1 %746 }
 0x25c   : > { %v1183_v38 = vpop.permute.xlu0 %1182  ;;  %v1343_v20 = vsel %vm1341_vm4, %v1310_v5, %v747_v13 }
 0x25d   : > { %v1492_v8 = vsel %vm1473_vm9, %v1459_v28, %v1183_v38 }
 0x25e   : > { %1922 = vmatprep.subr.msk.mxu0 %vm1510_vm10, %v1492_v8  ;;  %1949 = vmatprep.subr.msk.mxu1 %vm1510_vm10, %v1492_v8 }
 0x25f   : > { %v1151_v3 = vpop.permute.xlu1 %1150 }
 0x260   : > { %v1476_v52 = vsel %vm1473_vm9, %v1443_v31, %v1151_v3  ;;  %v880_v57 = vpop.permute.xlu0 %879 }
 0x261   : > { %1923 = vmatpush3.xpose.msk.msra.mxu0 %vm1510_vm10, %v1476_v52  ;;  %1965 = vmatpush3.xpose.msk.msra.mxu1 %vm1510_vm10, %v1476_v52  ;;  %v1392_v27 = vsel %vm1374_vm6, %v1359_v46, %v880_v57 }
 0x263   : > { %v978_v26 = vpop.permute.xlu1 %977 }
 0x264   : > { %v848_v63 = vpop.permute.xlu0 %847  ;;  %v1425_v58 = vsel %vm1407_vm7, %v1392_v27, %v978_v26 }
 0x265   : > { %v1376_v25 = vsel %vm1374_vm6, %v1343_v20, %v848_v63 }
 0x267   : > { %v946_v1 = vpop.permute.xlu1 %945 }
 0x268   : > { %v675_v32 = vpop.permute.xlu0 %674  ;;  %v1409_v59 = vsel %vm1407_vm7, %v1376_v25, %v946_v1 }
 0x269   : > { %v1325_v11 = vsel %vm1308_vm5, %v3986_v47, %v675_v32 }
 0x26b   : > { %v777_v14 = vpop.permute.xlu1 %776 }
 0x26c   : > { %v1080_v9 = vpop.permute.xlu0 %1079  ;;  %v1358_v0 = vsel %vm1341_vm4, %v1325_v11, %v777_v14 }
 0x26d   : > { %v1458_v19 = vsel %vm1440_vm8, %v1425_v58, %v1080_v9 }
 0x26f   : > { %v1181_v35 = vpop.permute.xlu1 %1180 }
 0x270   : > { %v1491_v44 = vsel %vm1473_vm9, %v1458_v19, %v1181_v35  ;;  %v1048_v56 = vpop.permute.xlu0 %1047 }
 0x271   : > { %1924 = vmatprep.subr.msk.mxu0 %vm1510_vm10, %v1491_v44  ;;  %1950 = vmatprep.subr.msk.mxu1 %vm1510_vm10, %v1491_v44  ;;  %v1442_v24 = vsel %vm1440_vm8, %v1409_v59, %v1048_v56 }
 0x273   : > { %v878_v18 = vpop.permute.xlu1 %877 }
 0x274   : > { %v745_v55 = vpop.permute.xlu0 %744  ;;  %v1391_v33 = vsel %vm1374_vm6, %v1358_v0, %v878_v18 }
 0x275   : > { %v1342_v22 = vsel %vm1341_vm4, %v1309_v21, %v745_v55 }
 0x277   : > { %v846_v42 = vpop.permute.xlu1 %845 }
 0x278   : > { %v1149_v15 = vpop.permute.xlu0 %1148  ;;  %v1375_v10 = vsel %vm1374_vm6, %v1342_v22, %v846_v42 }
 0x279   : > { %v1475_v60 = vsel %vm1473_vm9, %v1442_v24, %v1149_v15 }
 0x27a   : > { %1925 = vmatpush3.xpose.msk.msra.mxu0 %vm1510_vm10, %v1475_v60  ;;  %1966 = vmatpush3.xpose.msk.msra.mxu1 %vm1510_vm10, %v1475_v60 }
 0x27b   : > { %v944_v17 = vpop.permute.xlu1 %943 }
 0x27c   : > { %v976_v54 = vpop.permute.xlu0 %975  ;;  %v1408_v6 = vsel %vm1407_vm7, %v1375_v10, %v944_v17 }
 0x27d   : > { %v1424_v61 = vsel %vm1407_vm7, %v1391_v33, %v976_v54 }
 0x27f   : > { %v1046_v12 = vpop.permute.xlu1 %1045 }
 0x280   : > { %v1078_v30 = vpop.permute.xlu0 %1077  ;;  %v1441_v37 = vsel %vm1440_vm8, %v1408_v6, %v1046_v12 }
 0x281   : > { %v1457_v39 = vsel %vm1440_vm8, %v1424_v61, %v1078_v30 }
 0x283   : > { %v1147_v51 = vpop.permute.xlu1 %1146 }
 0x284   : > { %v1474_v36 = vsel %vm1473_vm9, %v1441_v37, %v1147_v51  ;;  %v1179_v16 = vpop.permute.xlu0 %1178 }
 0x285   : > { %v1490_v62 = vsel %vm1473_vm9, %v1457_v39, %v1179_v16 }
 0x286   : > { %1926 = vmatprep.subr.msk.mxu0 %vm1510_vm10, %v1490_v62  ;;  %1951 = vmatprep.subr.msk.mxu1 %vm1510_vm10, %v1490_v62 }
 0x287   : > { %1927 = vmatpush3.xpose.msk.msra.mxu0 %vm1510_vm10, %v1474_v36  ;;  %1967 = vmatpush3.xpose.msk.msra.mxu1 %vm1510_vm10, %v1474_v36 }
 0x28a   : > { %1929 = vmatmul.mubr.msk.f32.vlgmr.msra.gmra.mxu0 %vm1510_vm10, %v3497_v2  ;;  %1933 = vmatmul.mubr.msk.f32.vlgmr.msra.gmra.mxu1 %vm1510_vm10, %v3511_v4 }
 0x28b   : > { %1930 = vmatprep.mubr.msk.f32.mxu0 %vm1510_vm10, %v1507_v48  ;;  %1934 = vmatprep.mubr.msk.f32.mxu1 %vm1510_vm10, %v1509_v7 }
 0x28e   : > { %1931 = vmatmul.mubr.msk.f32.gmra.mxu0 %vm1510_vm10, %v1507_v48  ;;  %1935 = vmatmul.mubr.msk.f32.gmra.mxu1 %vm1510_vm10, %v1509_v7 }
 0x34a   : > { %v1685_v50 = vpop.f32.mrf.mxu0  ;;  %v1697_v13 = vpop.f32.mrf.mxu1 }
 0x34b   : > { %1708 = vst [vmem:[%s178_s10] sm:$0xff] %v1685_v50  ;;  %1712 = vst [vmem:[%s178_s10 + $0x20] sm:$0xff] %v1697_v13  ;;  %v1728_v52 = vmul.f32 %v1685_v50, %v1685_v50  ;;  %v1732_v57 = vmul.f32 %v1697_v13, %v1697_v13 }
 0x34c   : > { %v1687_v2 = vpop.f32.mrf.mxu0  ;;  %v1699_v40 = vpop.f32.mrf.mxu1 }
 0x34d   : > { %1709 = vst [vmem:[%s178_s10 + $0x8] sm:$0xff] %v1687_v2  ;;  %v1716_v4 = vadd.f32 %v1687_v2, %v1685_v50  ;;  %1713 = vst [vmem:[%s178_s10 + $0x28] sm:$0xff] %v1699_v40  ;;  %v1729_v34 = vmul.f32 %v1687_v2, %v1687_v2  ;;  %v1722_v31 = vadd.f32 %v1699_v40, %v1697_v13 }
 0x34e   : > { %v1691_v28 = vpop.f32.mrf.mxu0  ;;  %v1703_v38 = vpop.f32.mrf.mxu1  ;;  %v1733_v26 = vmul.f32 %v1699_v40, %v1699_v40 }
 0x34f   : > { %1710 = vst [vmem:[%s178_s10 + $0x10] sm:$0xff] %v1691_v28  ;;  %1717 = vadd.xlane.f32.xlu0 %v1716_v4  ;;  %1714 = vst [vmem:[%s178_s10 + $0x30] sm:$0xff] %v1703_v38  ;;  %v1730_v63 = vmul.f32 %v1691_v28, %v1691_v28  ;;  %v1736_v41 = vadd.f32 %v1729_v34, %v1728_v52  ;;  %v1734_v14 = vmul.f32 %v1703_v38, %v1703_v38 }
 0x350   : > { %v1693_v29 = vpop.f32.mrf.mxu0  ;;  %v1705_v8 = vpop.f32.mrf.mxu1  ;;  %v1742_v9 = vadd.f32 %v1733_v26, %v1732_v57 }
 0x351   : > { %1711 = vst [vmem:[%s178_s10 + $0x18] sm:$0xff] %v1693_v29  ;;  %v1719_v3 = vadd.f32 %v1693_v29, %v1691_v28  ;;  %1715 = vst [vmem:[%s178_s10 + $0x38] sm:$0xff] %v1705_v8  ;;  %v1731_v1 = vmul.f32 %v1693_v29, %v1693_v29  ;;  %v1725_v32 = vadd.f32 %v1705_v8, %v1703_v38 }
 0x352   : > { %v1735_v46 = vmul.f32 %v1705_v8, %v1705_v8 }
 0x353   : > { %1723 = vadd.xlane.f32.xlu0 %v1722_v31  ;;  %1720 = vadd.xlane.f32.xlu1 %v1719_v3  ;;  %v1739_v45 = vadd.f32 %v1731_v1, %v1730_v63 }
 0x354   : > { %v1745_v27 = vadd.f32 %v1735_v46, %v1734_v14 }
 0x357   : > { %1726 = vadd.xlane.f32.xlu0 %v1725_v32  ;;  %1737 = vadd.xlane.f32.xlu1 %v1736_v41 }
 0x35b   : > { %1740 = vadd.xlane.f32.xlu0 %v1739_v45  ;;  %1743 = vadd.xlane.f32.xlu1 %v1742_v9 }
 0x35f   : > { %1746 = vadd.xlane.f32.xlu0 %v1745_v27 }
 0x3d8   : > { %v1718_v58 = vpop.xlane.xlu0 %1717 }
 0x3dc   : > { %v1724_v19 = vpop.xlane.xlu0 %1723  ;;  %v1721_v35 = vpop.xlane.xlu1 %1720 }
 0x3e0   : > { %v1727_v44 = vpop.xlane.xlu0 %1726  ;;  %v1738_v56 = vpop.xlane.xlu1 %1737 }
 0x3e1   : > { %v1749_v18 = vsel %vm1748_vm11, %v1718_v58, %v1738_v56 }
 0x3e2   : > { %1754 = vst.msk [vmem:[%s183_s16] sm:$0xff] %vm1753_vm12, %v1749_v18 }
 0x3e4   : > { %v1741_v53 = vpop.xlane.xlu0 %1740  ;;  %v1744_v23 = vpop.xlane.xlu1 %1743 }
 0x3e5   : > { %v1750_v5 = vsel %vm1748_vm11, %v1721_v35, %v1741_v53  ;;  %v1751_v55 = vsel %vm1748_vm11, %v1724_v19, %v1744_v23 }
 0x3e6   : > { %1755 = vst.msk [vmem:[%s183_s16 + $0x8] sm:$0xff] %vm1753_vm12, %v1750_v5  ;;  %1756 = vst.msk [vmem:[%s183_s16 + $0x10] sm:$0xff] %vm1753_vm12, %v1751_v55 }
 0x3e8   : > { %v1747_v20 = vpop.xlane.xlu0 %1746 }
 0x3e9   : > { %v1752_v25 = vsel %vm1748_vm11, %v1727_v44, %v1747_v20 }
 0x3ea   : > { %1757 = vst.msk [vmem:[%s183_s16 + $0x18] sm:$0xff] %vm1753_vm12, %v1752_v25 }
 0x3eb PF: > { %s14_s12 = sadd.s32 1, %s2011_s12  }
 0x3ec   : > { %p11_p4 = scmp.ge.s32.totalorder %s14_s12, 4  }
 0x3ee   :  { %13 = sbr.rel (!%p11_p4) target bundleno = 1 (0x1), region = 70 }

</bundles_post_ra>
